<compile_context>
chip_gen: v7x
topology: tpu7x:2x2x1
jax: 0.10.0
libtpu: 0.0.40
codegen_flags: <defaults>
</compile_context>

<pallas_src>
import math
from functools import partial

import jax
import jax.numpy as jnp
from jax.experimental import pallas as pl
from jax.experimental.pallas import tpu as pltpu


def _round_up(x, m):
    return ((x + m - 1) // m) * m


def _cparams(sem):
    # 40 MiB is safe on every generation (v5e/v6e: 128 MiB physical,
    # v7x: 64 MiB physical -> stay well under).
    return pltpu.CompilerParams(dimension_semantics=sem,
                                vmem_limit_bytes=40 * 1024 * 1024)


def _row_cap(C):
    """Row-tile cap so an (rows, C) bf16 block is ~1 MiB (min 512 rows)."""
    return max(512, min(4096, (1 << 20) // max(1, 2 * C)))


def _rows_plan(M, cap):
    """Pick (tile_rows, padded_rows) so padded_rows % tile_rows == 0.

    Prefers a tile that divides M exactly (no pad/slice HBM round trip);
    falls back to padding M up to a multiple of `cap`.
    """
    cap = max(8, (cap // 8) * 8)
    if M <= cap:
        Mp = _round_up(M, 8)
        return Mp, Mp
    if M % 8 == 0:
        t = cap
        floor = max(8, cap // 4)
        while t >= floor:
            if M % t == 0:
                return t, M
            t -= 8
    Mp = _round_up(M, cap)
    return cap, Mp


def _pad_rows(x, Mp):
    M = x.shape[0]
    if Mp == M:
        return x
    return jnp.pad(x, ((0, Mp - M),) + ((0, 0),) * (x.ndim - 1))


def _pick_tk(K):
    if K % 512 == 0:
        return 512
    if K % 384 == 0:
        return 384
    if K % 256 == 0:
        return 256
    return 128


def _pick_tn(N):
    return 256 if N % 256 == 0 else 128


# ----------------------------------------------------------------------------
# Pallas kernels
# ----------------------------------------------------------------------------

def _matmul_kernel(a_ref, b_ref, o_ref, acc_ref):
    @pl.when(pl.program_id(2) == 0)
    def _():
        acc_ref[...] = jnp.zeros_like(acc_ref)

    acc_ref[...] += jnp.dot(a_ref[...], b_ref[...],
                            preferred_element_type=jnp.float32)

    @pl.when(pl.program_id(2) == pl.num_programs(2) - 1)
    def _():
        o_ref[...] = acc_ref[...].astype(o_ref.dtype)


def pallas_matmul(a, b, out_dtype=jnp.bfloat16):
    """(M, K) @ (K, N) -> (M, N); bf16 MXU operands, f32 accumulation."""
    M, K = a.shape
    _, N = b.shape
    a = a.astype(jnp.bfloat16)
    b = b.astype(jnp.bfloat16)
    tm, Mp = _rows_plan(M, 512)
    tk = _pick_tk(K)
    tn = _pick_tn(N)
    Kp, Np = _round_up(K, tk), _round_up(N, tn)
    a_p = a if (Mp == M and Kp == K) else jnp.pad(a, ((0, Mp - M), (0, Kp - K)))
    b_p = b if (Kp == K and Np == N) else jnp.pad(b, ((0, Kp - K), (0, Np - N)))
    out = pl.pallas_call(
        _matmul_kernel,
        out_shape=jax.ShapeDtypeStruct((Mp, Np), out_dtype),
        grid_spec=pltpu.PrefetchScalarGridSpec(
            num_scalar_prefetch=0,
            grid=(Mp // tm, Np // tn, Kp // tk),
            in_specs=[pl.BlockSpec((tm, tk), lambda i, j, k: (i, k)),
                      pl.BlockSpec((tk, tn), lambda i, j, k: (k, j))],
            out_specs=pl.BlockSpec((tm, tn), lambda i, j, k: (i, j)),
            scratch_shapes=[pltpu.VMEM((tm, tn), jnp.float32)]),
        compiler_params=_cparams(("parallel", "parallel", "arbitrary")),
    )(a_p, b_p)
    if Mp == M and Np == N:
        return out
    return out[:M, :N]


def _bn_stats_kernel(x_ref, sum_ref, sq_ref):
    @pl.when(pl.program_id(0) == 0)
    def _():
        sum_ref[...] = jnp.zeros_like(sum_ref)
        sq_ref[...] = jnp.zeros_like(sq_ref)

    x = x_ref[...].astype(jnp.float32)
    sum_ref[...] += jnp.sum(x, axis=0, keepdims=True)
    sq_ref[...] += jnp.sum(x * x, axis=0, keepdims=True)


@jax.jit
def bn_batch_stats(x2):
    """Per-channel (mean, biased var) over rows; f32 accumulation.

    TODO(synk): E[x^2]-E[x]^2 in f32 is kept (clamped); a Welford/two-pass
    formulation would be safer for large-mean channels.
    """
    M, C = x2.shape
    tm, Mp = _rows_plan(M, _row_cap(C))
    x_p = _pad_rows(x2, Mp)           # zero rows do not perturb the sums
    s, sq = pl.pallas_call(
        _bn_stats_kernel,
        out_shape=(jax.ShapeDtypeStruct((1, C), jnp.float32),
                   jax.ShapeDtypeStruct((1, C), jnp.float32)),
        grid_spec=pltpu.PrefetchScalarGridSpec(
            num_scalar_prefetch=0, grid=(Mp // tm,),
            in_specs=[pl.BlockSpec((tm, C), lambda i: (i, 0))],
            out_specs=(pl.BlockSpec((1, C), lambda i: (0, 0)),
                       pl.BlockSpec((1, C), lambda i: (0, 0)))),
        compiler_params=_cparams(("arbitrary",)),
    )(x_p)
    mean = s[0] / M                   # divide by the TRUE row count
    var = jnp.maximum(sq[0] / M - mean * mean, 0.0)
    return mean, var


def _affine_kernel(x_ref, sc_ref, sh_ref, o_ref, *, relu):
    y = x_ref[...].astype(jnp.float32) * sc_ref[...] + sh_ref[...]
    if relu:
        y = jnp.maximum(y, 0.0)
    o_ref[...] = y.astype(o_ref.dtype)


@partial(jax.jit, static_argnames=("relu",))
def affine_act(x2, scale, shift, relu=False):
    M, C = x2.shape
    tm, Mp = _rows_plan(M, _row_cap(C))
    x_p = _pad_rows(x2, Mp)
    out = pl.pallas_call(
        partial(_affine_kernel, relu=relu),
        out_shape=jax.ShapeDtypeStruct((Mp, C), jnp.bfloat16),
        grid_spec=pltpu.PrefetchScalarGridSpec(
            num_scalar_prefetch=0, grid=(Mp // tm,),
            in_specs=[pl.BlockSpec((tm, C), lambda i: (i, 0)),
                      pl.BlockSpec((1, C), lambda i: (0, 0)),
                      pl.BlockSpec((1, C), lambda i: (0, 0))],
            out_specs=pl.BlockSpec((tm, C), lambda i: (i, 0))),
        compiler_params=_cparams(("parallel",)),
    )(x_p, scale.reshape(1, C).astype(jnp.float32),
      shift.reshape(1, C).astype(jnp.float32))
    return out if Mp == M else out[:M]


def _affine_pool_kernel(x_ref, sc_ref, sh_ref, y_ref, avg_ref, max_ref, *, inv_hw):
    x = x_ref[...].astype(jnp.float32)                    # (1, HW, C)
    y = x * sc_ref[...] + sh_ref[...]
    y_ref[...] = y.astype(y_ref.dtype)
    avg_ref[...] = jnp.sum(y, axis=1, keepdims=True) * inv_hw
    max_ref[...] = jnp.max(y, axis=1, keepdims=True)


@jax.jit
def affine_pool(x3, scale, shift):
    """Fused BN affine + per-sample global avg/max pool. x3: (N, HW, C)."""
    N, HW, C = x3.shape
    y, avg, mx = pl.pallas_call(
        partial(_affine_pool_kernel, inv_hw=1.0 / HW),
        out_shape=(jax.ShapeDtypeStruct((N, HW, C), jnp.bfloat16),
                   jax.ShapeDtypeStruct((N, 1, C), jnp.float32),
                   jax.ShapeDtypeStruct((N, 1, C), jnp.float32)),
        grid_spec=pltpu.PrefetchScalarGridSpec(
            num_scalar_prefetch=0, grid=(N,),
            in_specs=[pl.BlockSpec((1, HW, C), lambda n: (n, 0, 0)),
                      pl.BlockSpec((1, 1, C), lambda n: (0, 0, 0)),
                      pl.BlockSpec((1, 1, C), lambda n: (0, 0, 0))],
            out_specs=(pl.BlockSpec((1, HW, C), lambda n: (n, 0, 0)),
                       pl.BlockSpec((1, 1, C), lambda n: (n, 0, 0)),
                       pl.BlockSpec((1, 1, C), lambda n: (n, 0, 0)))),
        compiler_params=_cparams(("parallel",)),
    )(x3, scale.reshape(1, 1, C).astype(jnp.float32),
      shift.reshape(1, 1, C).astype(jnp.float32))
    return y, avg[:, 0, :], mx[:, 0, :]


def _global_pool_kernel(x_ref, avg_ref, max_ref, *, inv_hw):
    x = x_ref[...].astype(jnp.float32)
    avg_ref[...] = jnp.sum(x, axis=1, keepdims=True) * inv_hw
    max_ref[...] = jnp.max(x, axis=1, keepdims=True)


@jax.jit
def global_pool(x3):
    N, HW, C = x3.shape
    avg, mx = pl.pallas_call(
        partial(_global_pool_kernel, inv_hw=1.0 / HW),
        out_shape=(jax.ShapeDtypeStruct((N, 1, C), jnp.float32),
                   jax.ShapeDtypeStruct((N, 1, C), jnp.float32)),
        grid_spec=pltpu.PrefetchScalarGridSpec(
            num_scalar_prefetch=0, grid=(N,),
            in_specs=[pl.BlockSpec((1, HW, C), lambda n: (n, 0, 0))],
            out_specs=(pl.BlockSpec((1, 1, C), lambda n: (n, 0, 0)),
                       pl.BlockSpec((1, 1, C), lambda n: (n, 0, 0)))),
        compiler_params=_cparams(("parallel",)),
    )(x3)
    return avg[:, 0, :], mx[:, 0, :]


def _channel_scale_pool_kernel(x_ref, att_ref, y_ref, cp_ref, *, inv_c):
    x = x_ref[...].astype(jnp.float32)                    # (1, HW, C)
    gate = 1.0 / (1.0 + jnp.exp(-att_ref[...]))           # sigmoid, (1, 1, C)
    y = x * gate
    y_ref[...] = y.astype(y_ref.dtype)
    cp_ref[:, :, 0:1] = jnp.max(y, axis=2, keepdims=True).astype(cp_ref.dtype)
    cp_ref[:, :, 1:2] = (jnp.sum(y, axis=2, keepdims=True) * inv_c
                         ).astype(cp_ref.dtype)


@jax.jit
def channel_scale_pool(x3, att):
    """Fused channel-attention gating + per-pixel [max, mean] over channels."""
    N, HW, C = x3.shape
    y, cp = pl.pallas_call(
        partial(_channel_scale_pool_kernel, inv_c=1.0 / C),
        out_shape=(jax.ShapeDtypeStruct((N, HW, C), jnp.bfloat16),
                   jax.ShapeDtypeStruct((N, HW, 2), jnp.bfloat16)),
        grid_spec=pltpu.PrefetchScalarGridSpec(
            num_scalar_prefetch=0, grid=(N,),
            in_specs=[pl.BlockSpec((1, HW, C), lambda n: (n, 0, 0)),
                      pl.BlockSpec((1, 1, C), lambda n: (n, 0, 0))],
            out_specs=(pl.BlockSpec((1, HW, C), lambda n: (n, 0, 0)),
                       pl.BlockSpec((1, HW, 2), lambda n: (n, 0, 0)))),
        compiler_params=_cparams(("parallel",)),
    )(x3, att.reshape(N, 1, C).astype(jnp.float32))
    return y, cp


def _gate_merge_kernel(y_ref, s_ref, idt_ref, sc_ref, sh_ref, o_ref):
    gate = 1.0 / (1.0 + jnp.exp(-s_ref[...].astype(jnp.float32)))   # (tm, 1)
    y = y_ref[...].astype(jnp.float32) * gate
    idt = idt_ref[...].astype(jnp.float32) * sc_ref[...] + sh_ref[...]
    o_ref[...] = jnp.maximum(y + idt, 0.0).astype(o_ref.dtype)


def _merge_kernel(y_ref, idt_ref, sc_ref, sh_ref, o_ref):
    y = y_ref[...].astype(jnp.float32)
    idt = idt_ref[...].astype(jnp.float32) * sc_ref[...] + sh_ref[...]
    o_ref[...] = jnp.maximum(y + idt, 0.0).astype(o_ref.dtype)


@jax.jit
def _residual_merge_gate(y2, s2, idt2, sc, sh):
    M, C = y2.shape
    tm, Mp = _rows_plan(M, _row_cap(C))
    out = pl.pallas_call(
        _gate_merge_kernel,
        out_shape=jax.ShapeDtypeStruct((Mp, C), jnp.bfloat16),
        grid_spec=pltpu.PrefetchScalarGridSpec(
            num_scalar_prefetch=0, grid=(Mp // tm,),
            in_specs=[pl.BlockSpec((tm, C), lambda i: (i, 0)),
                      pl.BlockSpec((tm, 1), lambda i: (i, 0)),
                      pl.BlockSpec((tm, C), lambda i: (i, 0)),
                      pl.BlockSpec((1, C), lambda i: (0, 0)),
                      pl.BlockSpec((1, C), lambda i: (0, 0))],
            out_specs=pl.BlockSpec((tm, C), lambda i: (i, 0))),
        compiler_params=_cparams(("parallel",)),
    )(_pad_rows(y2, Mp), _pad_rows(s2, Mp), _pad_rows(idt2, Mp),
      sc.reshape(1, C).astype(jnp.float32), sh.reshape(1, C).astype(jnp.float32))
    return out if Mp == M else out[:M]


@jax.jit
def _residual_merge_plain(y2, idt2, sc, sh):
    M, C = y2.shape
    tm, Mp = _rows_plan(M, _row_cap(C))
    out = pl.pallas_call(
        _merge_kernel,
        out_shape=jax.ShapeDtypeStruct((Mp, C), jnp.bfloat16),
        grid_spec=pltpu.PrefetchScalarGridSpec(
            num_scalar_prefetch=0, grid=(Mp // tm,),
            in_specs=[pl.BlockSpec((tm, C), lambda i: (i, 0)),
                      pl.BlockSpec((tm, C), lambda i: (i, 0)),
                      pl.BlockSpec((1, C), lambda i: (0, 0)),
                      pl.BlockSpec((1, C), lambda i: (0, 0))],
            out_specs=pl.BlockSpec((tm, C), lambda i: (i, 0))),
        compiler_params=_cparams(("parallel",)),
    )(_pad_rows(y2, Mp), _pad_rows(idt2, Mp),
      sc.reshape(1, C).astype(jnp.float32), sh.reshape(1, C).astype(jnp.float32))
    return out if Mp == M else out[:M]


def residual_merge(y2, idt2, sc, sh, s_aff=None):
    """relu( [sigmoid(s_aff)*]y + idt*sc + sh )  — fused residual epilogue."""
    if s_aff is None:
        return _residual_merge_plain(y2, idt2, sc, sh)
    return _residual_merge_gate(y2, s_aff, idt2, sc, sh)


# ----------------------------------------------------------------------------
# Model glue (plain JAX: im2col, reshapes, tiny per-channel scalar math)
# ----------------------------------------------------------------------------

def im2col(x, kh, kw, stride, pad):
    # TODO(synk): im2col is still materialized in HBM (now in bf16); fusing it
    # into the matmul K-loop via element-offset BlockSpecs / manual DMA is the
    # remaining HBM-bandwidth win.
    if pad:
        x = jnp.pad(x, ((0, 0), (pad, pad), (pad, pad), (0, 0)))
    N, H, W, C = x.shape
    oh = (H - kh) // stride + 1
    ow = (W - kw) // stride + 1
    cols = []
    for i in range(kh):
        for j in range(kw):
            cols.append(x[:, i:i + stride * (oh - 1) + 1:stride,
                             j:j + stride * (ow - 1) + 1:stride, :])
    patches = jnp.stack(cols, axis=3)                     # (N, oh, ow, kh*kw, C)
    return patches.reshape(N * oh * ow, kh * kw * C), (N, oh, ow)


@partial(jax.jit, static_argnames=("kh", "kw", "stride", "pad", "out_dtype"))
def conv2d(x, w2d, kh=1, kw=1, stride=1, pad=0, out_dtype=jnp.bfloat16):
    """x: NHWC bf16, w2d: (kh*kw*Cin, Cout) bf16 (pre-reshaped at init)."""
    N, H, W, C = x.shape
    if kh == 1 and kw == 1 and pad == 0:
        xs = x[:, ::stride, ::stride, :] if stride > 1 else x
        n, oh, ow, _ = xs.shape
        patches = xs.reshape(n * oh * ow, C)
    else:
        patches, (n, oh, ow) = im2col(x, kh, kw, stride, pad)
    out = pallas_matmul(patches, w2d, out_dtype=out_dtype)
    return out.reshape(n, oh, ow, w2d.shape[1])


@jax.jit
def dense(x, w_bf16, b):
    return pallas_matmul(x.astype(jnp.bfloat16), w_bf16,
                         out_dtype=jnp.float32) + b


def batchnorm2d(x, gamma, beta, relu=False, eps=1e-5):
    """Training-mode BatchNorm2d (batch stats, biased variance), NHWC input."""
    n, h, w, c = x.shape
    x2 = x.reshape(n * h * w, c)
    mean, var = bn_batch_stats(x2)
    scale = gamma * jax.lax.rsqrt(var + eps)
    shift = beta - mean * scale
    return affine_act(x2, scale, shift, relu=relu).reshape(n, h, w, c)


def maxpool_3x3_s2_p1(x):
    # TODO(synk): windowed 3x3/stride-2 max pooling kept as plain-JAX
    # lax.reduce_window glue (no clean rectangular-tile Pallas mapping).
    return jax.lax.reduce_window(
        x, jnp.array(-jnp.inf, x.dtype), jax.lax.max,
        (1, 3, 3, 1), (1, 2, 2, 1), ((0, 0), (1, 1), (1, 1), (0, 0)))


def bottleneck(x, p, with_cbam=True):
    stride = p["stride"]
    out = conv2d(x, p["w1"], kh=1, kw=1, stride=stride, pad=0)
    out = batchnorm2d(out, p["g1"], p["b1"], relu=True)
    out = conv2d(out, p["w2"], kh=3, kw=3, stride=1, pad=1)
    out = batchnorm2d(out, p["g2"], p["b2"], relu=True)
    out = conv2d(out, p["w3"], kh=1, kw=1, stride=1, pad=0)  # raw conv3 output
    n, h, w, c = out.shape
    M = n * h * w

    # bn3 affine parameters (training-mode batch statistics)
    mean3, var3 = bn_batch_stats(out.reshape(M, c))
    scale3 = p["g3"] * jax.lax.rsqrt(var3 + 1e-5)
    shift3 = p["b3"] - mean3 * scale3

    # identity branch: raw conv (if downsample) + its BN affine folded into
    # the final merge kernel.
    if "wd" in p:
        idt = conv2d(x, p["wd"], kh=1, kw=1, stride=stride, pad=0)
        mi, vi = bn_batch_stats(idt.reshape(M, c))
        sc_i = p["gd"] * jax.lax.rsqrt(vi + 1e-5)
        sh_i = p["bd"] - mi * sc_i
    else:
        idt = x
        sc_i = jnp.ones((c,), jnp.float32)
        sh_i = jnp.zeros((c,), jnp.float32)

    if with_cbam:
        cb = p["cbam"]
        # bn3 affine fused with CBAM global avg/max pooling
        y3, avg, mx = affine_pool(out.reshape(n, h * w, c), scale3, shift3)
        # shared MLP on avg & max branches, summed
        pooled = jnp.concatenate([avg, mx], axis=0)                 # (2n, c)
        hid = jnp.maximum(dense(pooled, cb["w1"], cb["b1"]), 0.0)
        att = dense(hid, cb["w2"], cb["b2"])
        att = att[:n] + att[n:]
        # channel gating fused with the [max, mean]-over-C pooling
        y_cs, cp = channel_scale_pool(y3, att)
        # spatial attention: 7x7 conv (2->1) + 1-channel training-mode BN
        s = conv2d(cp.reshape(n, h, w, 2), cb["sw"], kh=7, kw=7, stride=1,
                   pad=3, out_dtype=jnp.float32)                    # (n,h,w,1)
        s2 = s.reshape(M, 1)
        sm = jnp.mean(s2)
        sv = jnp.mean(jnp.square(s2 - sm))
        ssc = cb["sg"][0] * jax.lax.rsqrt(sv + 1e-5)
        ssh = cb["sb"][0] - sm * ssc
        s_aff = s2 * ssc + ssh
        # fused: sigmoid-gate * y + BN(identity) , then ReLU
        y = residual_merge(y_cs.reshape(M, c), idt.reshape(M, c),
                           sc_i, sh_i, s_aff=s_aff)
    else:
        y3 = affine_act(out.reshape(M, c), scale3, shift3, relu=False)
        y = residual_merge(y3, idt.reshape(M, c), sc_i, sh_i, s_aff=None)
    return y.reshape(n, h, w, c)


def resnet50_forward(params, x_nchw, with_cbam=True):
    x = jnp.transpose(x_nchw, (0, 2, 3, 1)).astype(jnp.bfloat16)   # -> NHWC bf16
    # conv_block1: conv7x7/s2 + BN + ReLU + maxpool3x3/s2
    x = conv2d(x, params["conv1_w"], kh=7, kw=7, stride=2, pad=3)
    x = batchnorm2d(x, params["bn1_g"], params["bn1_b"], relu=True)
    x = maxpool_3x3_s2_p1(x)
    # layer1..layer4
    for layer in params["layers"]:
        for blk in layer:
            x = bottleneck(x, blk, with_cbam=with_cbam)
    x_conv = x                                                     # (N, 7, 7, 2048)
    n, h, w, c = x_conv.shape
    # AvgPool2d(7) on a 7x7 map == global average per channel
    avg, _ = global_pool(x_conv.reshape(n, h * w, c))              # (N, 2048) f32
    logits = dense(avg, params["fc_w"], params["fc_b"])            # (N, 6) f32
    return (jnp.transpose(x_conv, (0, 3, 1, 2)).astype(jnp.float32), logits)


# ----------------------------------------------------------------------------
# Deterministic parameter initialization (shapes follow the PyTorch module);
# conv/FC weights are pre-reshaped to 2D GEMM layout and pre-cast to bf16.
# ----------------------------------------------------------------------------

def init_params(key, image_depth=3, num_classes=6, with_cbam=True):
    key_holder = [key]

    def nk():
        key_holder[0], sub = jax.random.split(key_holder[0])
        return sub

    def conv_w(kh, kw, cin, cout):
        std = math.sqrt(2.0 / (kh * kw * cin))
        w = jax.random.normal(nk(), (kh, kw, cin, cout), jnp.float32) * std
        # (kh, kw, cin) ordering with cin fastest == im2col patch ordering
        return w.reshape(kh * kw * cin, cout).astype(jnp.bfloat16)

    def dense_w(cin, cout):
        std = math.sqrt(1.0 / cin)
        w = jax.random.normal(nk(), (cin, cout), jnp.float32) * std
        return w.astype(jnp.bfloat16)

    params = {
        "conv1_w": conv_w(7, 7, image_depth, 64),
        "bn1_g": jnp.ones((64,), jnp.float32),
        "bn1_b": jnp.zeros((64,), jnp.float32),
    }
    expansion = 4
    in_ch = 64
    layers_cfg = [(64, 3, 1), (128, 3, 2), (256, 3, 2), (512, 2, 2)]
    layers = []
    for out_ch, nblocks, stride0 in layers_cfg:
        blocks = []
        for s in [stride0] + [1] * (nblocks - 1):
            blk = {
                "stride": s,
                "w1": conv_w(1, 1, in_ch, out_ch),
                "g1": jnp.ones((out_ch,), jnp.float32), "b1": jnp.zeros((out_ch,), jnp.float32),
                "w2": conv_w(3, 3, out_ch, out_ch),
                "g2": jnp.ones((out_ch,), jnp.float32), "b2": jnp.zeros((out_ch,), jnp.float32),
                "w3": conv_w(1, 1, out_ch, out_ch * expansion),
                "g3": jnp.ones((out_ch * expansion,), jnp.float32),
                "b3": jnp.zeros((out_ch * expansion,), jnp.float32),
            }
            if s != 1 or in_ch != out_ch * expansion:
                blk["wd"] = conv_w(1, 1, in_ch, out_ch * expansion)
                blk["gd"] = jnp.ones((out_ch * expansion,), jnp.float32)
                blk["bd"] = jnp.zeros((out_ch * expansion,), jnp.float32)
            if with_cbam:
                C = out_ch * expansion
                r = C // 16
                blk["cbam"] = {
                    "w1": dense_w(C, r), "b1": jnp.zeros((r,), jnp.float32),
                    "w2": dense_w(r, C), "b2": jnp.zeros((C,), jnp.float32),
                    "sw": conv_w(7, 7, 2, 1),
                    "sg": jnp.ones((1,), jnp.float32), "sb": jnp.zeros((1,), jnp.float32),
                }
            blocks.append(blk)
            in_ch = out_ch * expansion
        layers.append(blocks)
    params["layers"] = layers
    params["fc_w"] = dense_w(512 * expansion, num_classes)
    params["fc_b"] = jnp.zeros((num_classes,), jnp.float32)
    return params


if __name__ == "__main__":
    key = jax.random.PRNGKey(0)
    pkey, xkey = jax.random.split(key)
    params = init_params(pkey, image_depth=3, num_classes=6, with_cbam=True)
    # 224x224 is the smallest canonical input that keeps AvgPool2d(7) valid
    # (layer4 output must be at least 7x7).
    x = jax.random.normal(xkey, (2, 3, 224, 224), jnp.float32)
    x_conv, logits = resnet50_forward(params, x, with_cbam=True)
    jax.block_until_ready((x_conv, logits))
    assert x_conv.shape == (2, 2048, 7, 7), x_conv.shape
    assert logits.shape == (2, 6), logits.shape
    assert bool(jnp.all(jnp.isfinite(logits)))
    print("KERNEL_OK")
</pallas_src>

<mosaic_0001>
module attributes {stable_mosaic.version = 11 : i64} {
  func.func @_matmul_kernel(%arg0: i32, %arg1: i32, %arg2: i32, %arg3: memref<512x128xbf16, #tpu.memory_space<vmem>>, %arg4: memref<128x128xbf16, #tpu.memory_space<vmem>>, %arg5: memref<512x128xbf16, #tpu.memory_space<vmem>>, %arg6: memref<512x128xf32, #tpu.memory_space<vmem>>) attributes {dimension_semantics = [#tpu.dimension_semantics<parallel>, #tpu.dimension_semantics<parallel>, #tpu.dimension_semantics<arbitrary>], iteration_bounds = array<i64: 49, 1, 2>, scalar_prefetch = 0 : i64, scratch_operands = 1 : i64, tpu.core_type = #tpu.core_type<tc>, window_params = [{transform_indices = @transform_0, window_bounds = array<i64: 512, 128>}, {transform_indices = @transform_1, window_bounds = array<i64: 128, 128>}, {transform_indices = @transform_2, window_bounds = array<i64: 512, 128>}]} {
    %c0_i32 = arith.constant 0 : i32
    %0 = arith.cmpi eq, %arg2, %c0_i32 : i32
    %1 = arith.extui %0 : i1 to i32
    %c0_i32_0 = arith.constant 0 : i32
    %2 = arith.cmpi ne, %1, %c0_i32_0 : i32
    scf.if %2 {
      %cst_9 = arith.constant 0.000000e+00 : f32
      %12 = vector.broadcast %cst_9 : f32 to vector<512x128xf32>
      %c0_10 = arith.constant 0 : index
      %c0_11 = arith.constant 0 : index
      %13 = vector.load %arg6[%c0_10, %c0_11] : memref<512x128xf32, #tpu.memory_space<vmem>>, vector<512x128xf32>
      tpu.vector_store %arg6[%c0_10, %c0_11], %12 {strides = array<i32>} : memref<512x128xf32, #tpu.memory_space<vmem>>, vector<512x128xf32>,
    } else {
    }
    %c0 = arith.constant 0 : index
    %c0_1 = arith.constant 0 : index
    %3 = vector.load %arg6[%c0, %c0_1] : memref<512x128xf32, #tpu.memory_space<vmem>>, vector<512x128xf32>
    %c0_2 = arith.constant 0 : index
    %c0_3 = arith.constant 0 : index
    %4 = vector.load %arg3[%c0_2, %c0_3] : memref<512x128xbf16, #tpu.memory_space<vmem>>, vector<512x128xbf16>
    %c0_4 = arith.constant 0 : index
    %c0_5 = arith.constant 0 : index
    %5 = vector.load %arg4[%c0_4, %c0_5] : memref<128x128xbf16, #tpu.memory_space<vmem>>, vector<128x128xbf16>
    %cst = arith.constant dense<0.000000e+00> : vector<512x128xf32>
    %6 = tpu.matmul %4, %5, %cst {dimension_numbers = #tpu.dot_dimension_numbers<[1], [0], [0], [1], [0, 0, 1, 1], [], []>} : vector<512x128xbf16>, vector<128x128xbf16>, vector<512x128xf32> -> vector<512x128xf32>
    %7 = arith.addf %3, %6 : vector<512x128xf32>
    %c0_6 = arith.constant 0 : index
    %c0_7 = arith.constant 0 : index
    %8 = vector.load %arg6[%c0_6, %c0_7] : memref<512x128xf32, #tpu.memory_space<vmem>>, vector<512x128xf32>
    tpu.vector_store %arg6[%c0_6, %c0_7], %7 {strides = array<i32>} : memref<512x128xf32, #tpu.memory_space<vmem>>, vector<512x128xf32>,
    %c1_i32 = arith.constant 1 : i32
    %9 = arith.cmpi eq, %arg2, %c1_i32 : i32
    %10 = arith.extui %9 : i1 to i32
    %c0_i32_8 = arith.constant 0 : i32
    %11 = arith.cmpi ne, %10, %c0_i32_8 : i32
    scf.if %11 {
      %c0_9 = arith.constant 0 : index
      %c0_10 = arith.constant 0 : index
      %12 = vector.load %arg6[%c0_9, %c0_10] : memref<512x128xf32, #tpu.memory_space<vmem>>, vector<512x128xf32>
      %13 = arith.truncf %12 : vector<512x128xf32> to vector<512x128xbf16>
      %c0_11 = arith.constant 0 : index
      %c0_12 = arith.constant 0 : index
      %14 = vector.load %arg5[%c0_11, %c0_12] : memref<512x128xbf16, #tpu.memory_space<vmem>>, vector<512x128xbf16>
      tpu.vector_store %arg5[%c0_11, %c0_12], %13 {strides = array<i32>} : memref<512x128xbf16, #tpu.memory_space<vmem>>, vector<512x128xbf16>,
    } else {
    }
    return
  }
  func.func @transform_0(%arg0: i32, %arg1: i32, %arg2: i32) -> (i32, i32) {
    %c0_i32 = arith.constant 0 : i32
    return %arg0, %arg2 : i32, i32
  }
  func.func @transform_1(%arg0: i32, %arg1: i32, %arg2: i32) -> (i32, i32) {
    %c0_i32 = arith.constant 0 : i32
    return %arg2, %arg1 : i32, i32
  }
  func.func @transform_2(%arg0: i32, %arg1: i32, %arg2: i32) -> (i32, i32) {
    %c0_i32 = arith.constant 0 : i32
    return %arg0, %arg1 : i32, i32
  }
}

</mosaic_0001>

<bundles_post_ra>
// kernel: conv2d.1
= control target key start
LH: loop header
LB: loop body
LE: loop exit
PB: predicated region body
PF: predicated region fallthrough
CT: control target
= control target key end

     0   :  { %s2549_s9 = smov 0   ;;  %s2551_s10 = smov 0   ;;  %s2917_s0 = inlined_call_operand.vmem [shape: bf16[25088,256], index: 0, kind: input, shape index: {}]   ;;  %s2918_s1 = inlined_call_operand.vmem [shape: bf16[256,128], index: 1, kind: input, shape index: {}]   ;;  %s2919_s2 = inlined_call_operand.vmem [shape: bf16[25088,128], index: 2, kind: output, shape index: {}]  }
   0x1   :  { %s2553_s11 = smov 0   ;;  %s2555_s12 = smov 0  }
   0x2   :  { %s2557_s13 = smov 0   ;;  %s2559_s14 = smov 0  }
   0x3   :  { %s2561_s15 = smov 0  }
   0x4 LB: > { %s24_s16 = sadd.s32 1, %s2523_s13  ;;  %s31_s17 = sadd.s32 1, %s2527_s14  ;;  %s2531_s15 = sphi %s2561_s15, %s12_s15   ;;  %s2527_s14 = sphi %s2559_s14, %s2925_s14   ;;  %s2523_s13 = sphi %s2557_s13, %s2924_s13   ;;  %s2519_s12 = sphi %s2555_s12, %s2923_s12   ;;  %s2515_s11 = sphi %s2553_s11, %s2922_s11   ;;  %s2511_s10 = sphi %s2551_s10, %s2921_s10   ;;  %s2507_s9 = sphi %s2549_s9, %s2920_s9  }
   0x5   : > { %p25_p0 = scmp.ge.s32.totalorder %s24_s16, 2  ;;  %p47_p1 = scmp.ne.s32.totalorder %s2511_s10, %s2507_s9 }
   0x6   : > { %p48_p2 = scmp.eq.s32.totalorder %s2531_s15, 0  ;;  %s40_s21 = sadd.s32 1, %s2511_s10 }
   0x7   : > { %s2927_s16 = smov (%p25_p0, %s24_s16), 0  ;;  %s2929_s17 = smov (!%p25_p0, %s31_s17), %s2527_s14 }
   0x8   : > { %p49_p3 = por %p48_p2, %p47_p1  ;;  %p33_p4 = scmp.ge.s32.totalorder %s2929_s17, 49 }
   0x9   : > { %s36_s18 = ssub.s32 %s2523_s13, %s2927_s16  ;;  %p1869_p6 = scmp.ge.s32.totalorder %s2531_s15, 98 }
   0xa   : > { %s2931_s17 = smov (%p33_p4, %s2929_s17), 0 }
   0xb   : > { %s35_s19 = ssub.s32 %s2527_s14, %s2931_s17  ;;  %129 = sbr.rel (%p1869_p6) target bundleno = 66 (0x42), region = 16 }
   0xc   : > { %s37_s20 = sor.u32 %s36_s18, %s35_s19 }
   0xd   : > { %p38_p5 = scmp.eq.s32.totalorder %s37_s20, 0 }
   0xf   : > { %s2600_s22 = scalar_select %p38_p5, %s2511_s10, %s40_s21  }
  0x12   : > { %132 = sbr.rel (!%p49_p3) target bundleno = 66 (0x42), region = 20  ;;  %s134_s23 = sand.u32 (%p49_p3), 1, %s2511_s10  }
  0x13   : > { %s1988_s24 = sshll.u32 (%p49_p3), %s2527_s14, 7  ;;  %s1870_s25 = sshll.u32 (%p49_p3), %s134_s23, 8 }
  0x14   : > { %s139_s26 = sadd.s32 (%p49_p3), %s2523_s13, %s1988_s24  ;;  %s2614_s3 = scalar_lea.vmem (%p49_p3), [#allocation3], %s1870_s25 }
  0x15   : > { %s1873_s27 = sshll.u32 (%p49_p3), %s139_s26, 2 }
  0x16   : > { %s2609_s30 = scalar_lea.vmem (%p49_p3), %s2917_s0, %s1873_s27 }
  0x17   : > { %v157_v0 = vld [vmem:[%s2609_s30] sm:$0xf] (%p49_p3)  ;;  %v159_v1 = vld [vmem:[%s2609_s30 + $0x8] sm:$0xf] (%p49_p3)  ;;  %v161_v2 = vld [vmem:[%s2609_s30 + $0x10] sm:$0xf] (%p49_p3) }
  0x18   : > { %158 = vst [vmem:[%s2614_s3] sm:$0xf] (%p49_p3), %v157_v0  ;;  %160 = vst [vmem:[%s2614_s3 + $0x4] sm:$0xf] (%p49_p3), %v159_v1  ;;  %v163_v3 = vld [vmem:[%s2609_s30 + $0x18] sm:$0xf] (%p49_p3) }
  0x19   : > { %162 = vst [vmem:[%s2614_s3 + $0x8] sm:$0xf] %v161_v2  ;;  %v165_v4 = vld [vmem:[%s2609_s30 + $0x20] sm:$0xf]  ;;  %v167_v5 = vld [vmem:[%s2609_s30 + $0x28] sm:$0xf] }
  0x1a   : > { %164 = vst [vmem:[%s2614_s3 + $0xc] sm:$0xf] %v163_v3  ;;  %166 = vst [vmem:[%s2614_s3 + $0x10] sm:$0xf] %v165_v4  ;;  %v169_v6 = vld [vmem:[%s2609_s30 + $0x30] sm:$0xf] }
  0x1b   : > { %168 = vst [vmem:[%s2614_s3 + $0x14] sm:$0xf] %v167_v5  ;;  %v171_v7 = vld [vmem:[%s2609_s30 + $0x38] sm:$0xf]  ;;  %v173_v8 = vld [vmem:[%s2609_s30 + $0x40] sm:$0xf] }
  0x1c   : > { %170 = vst [vmem:[%s2614_s3 + $0x18] sm:$0xf] %v169_v6  ;;  %172 = vst [vmem:[%s2614_s3 + $0x1c] sm:$0xf] %v171_v7  ;;  %v175_v9 = vld [vmem:[%s2609_s30 + $0x48] sm:$0xf] }
  0x1d   : > { %174 = vst [vmem:[%s2614_s3 + $0x20] sm:$0xf] %v173_v8  ;;  %v177_v10 = vld [vmem:[%s2609_s30 + $0x50] sm:$0xf]  ;;  %v179_v11 = vld [vmem:[%s2609_s30 + $0x58] sm:$0xf] }
  0x1e   : > { %176 = vst [vmem:[%s2614_s3 + $0x24] sm:$0xf] %v175_v9  ;;  %178 = vst [vmem:[%s2614_s3 + $0x28] sm:$0xf] %v177_v10  ;;  %v181_v12 = vld [vmem:[%s2609_s30 + $0x60] sm:$0xf] }
  0x1f   : > { %180 = vst [vmem:[%s2614_s3 + $0x2c] sm:$0xf] %v179_v11  ;;  %v183_v13 = vld [vmem:[%s2609_s30 + $0x68] sm:$0xf]  ;;  %v185_v14 = vld [vmem:[%s2609_s30 + $0x70] sm:$0xf] }
  0x20   : > { %182 = vst [vmem:[%s2614_s3 + $0x30] sm:$0xf] %v181_v12  ;;  %184 = vst [vmem:[%s2614_s3 + $0x34] sm:$0xf] %v183_v13  ;;  %v187_v15 = vld [vmem:[%s2609_s30 + $0x78] sm:$0xf] }
  0x21   : > { %186 = vst [vmem:[%s2614_s3 + $0x38] sm:$0xf] %v185_v14  ;;  %v189_v16 = vld [vmem:[%s2609_s30 + $0x80] sm:$0xf]  ;;  %v191_v17 = vld [vmem:[%s2609_s30 + $0x88] sm:$0xf] }
  0x22   : > { %188 = vst [vmem:[%s2614_s3 + $0x3c] sm:$0xf] %v187_v15  ;;  %190 = vst [vmem:[%s2614_s3 + $0x40] sm:$0xf] %v189_v16  ;;  %v193_v18 = vld [vmem:[%s2609_s30 + $0x90] sm:$0xf] }
  0x23   : > { %192 = vst [vmem:[%s2614_s3 + $0x44] sm:$0xf] %v191_v17  ;;  %v195_v19 = vld [vmem:[%s2609_s30 + $0x98] sm:$0xf]  ;;  %v197_v20 = vld [vmem:[%s2609_s30 + $0xa0] sm:$0xf] }
  0x24   : > { %194 = vst [vmem:[%s2614_s3 + $0x48] sm:$0xf] %v193_v18  ;;  %196 = vst [vmem:[%s2614_s3 + $0x4c] sm:$0xf] %v195_v19  ;;  %v199_v21 = vld [vmem:[%s2609_s30 + $0xa8] sm:$0xf] }
  0x25   : > { %198 = vst [vmem:[%s2614_s3 + $0x50] sm:$0xf] %v197_v20  ;;  %v201_v22 = vld [vmem:[%s2609_s30 + $0xb0] sm:$0xf]  ;;  %v203_v23 = vld [vmem:[%s2609_s30 + $0xb8] sm:$0xf] }
  0x26   : > { %200 = vst [vmem:[%s2614_s3 + $0x54] sm:$0xf] %v199_v21  ;;  %202 = vst [vmem:[%s2614_s3 + $0x58] sm:$0xf] %v201_v22  ;;  %v205_v24 = vld [vmem:[%s2609_s30 + $0xc0] sm:$0xf] }
  0x27   : > { %204 = vst [vmem:[%s2614_s3 + $0x5c] sm:$0xf] %v203_v23  ;;  %v207_v25 = vld [vmem:[%s2609_s30 + $0xc8] sm:$0xf]  ;;  %v209_v26 = vld [vmem:[%s2609_s30 + $0xd0] sm:$0xf] }
  0x28   : > { %206 = vst [vmem:[%s2614_s3 + $0x60] sm:$0xf] %v205_v24  ;;  %208 = vst [vmem:[%s2614_s3 + $0x64] sm:$0xf] %v207_v25  ;;  %v211_v27 = vld [vmem:[%s2609_s30 + $0xd8] sm:$0xf] }
  0x29   : > { %210 = vst [vmem:[%s2614_s3 + $0x68] sm:$0xf] %v209_v26  ;;  %v213_v28 = vld [vmem:[%s2609_s30 + $0xe0] sm:$0xf]  ;;  %v215_v29 = vld [vmem:[%s2609_s30 + $0xe8] sm:$0xf] }
  0x2a   : > { %212 = vst [vmem:[%s2614_s3 + $0x6c] sm:$0xf] %v211_v27  ;;  %214 = vst [vmem:[%s2614_s3 + $0x70] sm:$0xf] %v213_v28  ;;  %v217_v30 = vld [vmem:[%s2609_s30 + $0xf0] sm:$0xf] }
  0x2b   : > { %216 = vst [vmem:[%s2614_s3 + $0x74] sm:$0xf] %v215_v29  ;;  %v219_v31 = vld [vmem:[%s2609_s30 + $0xf8] sm:$0xf]  ;;  %v221_v32 = vld [vmem:[%s2609_s30 + $0x100] sm:$0xf] }
  0x2c   : > { %218 = vst [vmem:[%s2614_s3 + $0x78] sm:$0xf] %v217_v30  ;;  %220 = vst [vmem:[%s2614_s3 + $0x7c] sm:$0xf] %v219_v31  ;;  %v223_v33 = vld [vmem:[%s2609_s30 + $0x108] sm:$0xf] }
  0x2d   : > { %222 = vst [vmem:[%s2614_s3 + $0x80] sm:$0xf] %v221_v32  ;;  %v225_v34 = vld [vmem:[%s2609_s30 + $0x110] sm:$0xf]  ;;  %v227_v35 = vld [vmem:[%s2609_s30 + $0x118] sm:$0xf] }
  0x2e   : > { %224 = vst [vmem:[%s2614_s3 + $0x84] sm:$0xf] %v223_v33  ;;  %226 = vst [vmem:[%s2614_s3 + $0x88] sm:$0xf] %v225_v34  ;;  %v229_v36 = vld [vmem:[%s2609_s30 + $0x120] sm:$0xf] }
  0x2f   : > { %228 = vst [vmem:[%s2614_s3 + $0x8c] sm:$0xf] %v227_v35  ;;  %v231_v37 = vld [vmem:[%s2609_s30 + $0x128] sm:$0xf]  ;;  %v233_v38 = vld [vmem:[%s2609_s30 + $0x130] sm:$0xf] }
  0x30   : > { %230 = vst [vmem:[%s2614_s3 + $0x90] sm:$0xf] %v229_v36  ;;  %232 = vst [vmem:[%s2614_s3 + $0x94] sm:$0xf] %v231_v37  ;;  %v235_v39 = vld [vmem:[%s2609_s30 + $0x138] sm:$0xf] }
  0x31   : > { %234 = vst [vmem:[%s2614_s3 + $0x98] sm:$0xf] %v233_v38  ;;  %v237_v40 = vld [vmem:[%s2609_s30 + $0x140] sm:$0xf]  ;;  %v239_v41 = vld [vmem:[%s2609_s30 + $0x148] sm:$0xf] }
  0x32   : > { %236 = vst [vmem:[%s2614_s3 + $0x9c] sm:$0xf] %v235_v39  ;;  %238 = vst [vmem:[%s2614_s3 + $0xa0] sm:$0xf] %v237_v40  ;;  %v241_v42 = vld [vmem:[%s2609_s30 + $0x150] sm:$0xf] }
  0x33   : > { %240 = vst [vmem:[%s2614_s3 + $0xa4] sm:$0xf] %v239_v41  ;;  %v243_v43 = vld [vmem:[%s2609_s30 + $0x158] sm:$0xf]  ;;  %v245_v44 = vld [vmem:[%s2609_s30 + $0x160] sm:$0xf] }
  0x34   : > { %242 = vst [vmem:[%s2614_s3 + $0xa8] sm:$0xf] %v241_v42  ;;  %244 = vst [vmem:[%s2614_s3 + $0xac] sm:$0xf] %v243_v43  ;;  %v247_v45 = vld [vmem:[%s2609_s30 + $0x168] sm:$0xf] }
  0x35   : > { %246 = vst [vmem:[%s2614_s3 + $0xb0] sm:$0xf] %v245_v44  ;;  %v249_v46 = vld [vmem:[%s2609_s30 + $0x170] sm:$0xf]  ;;  %v251_v47 = vld [vmem:[%s2609_s30 + $0x178] sm:$0xf] }
  0x36   : > { %248 = vst [vmem:[%s2614_s3 + $0xb4] sm:$0xf] %v247_v45  ;;  %250 = vst [vmem:[%s2614_s3 + $0xb8] sm:$0xf] %v249_v46  ;;  %v253_v48 = vld [vmem:[%s2609_s30 + $0x180] sm:$0xf] }
  0x37   : > { %252 = vst [vmem:[%s2614_s3 + $0xbc] sm:$0xf] %v251_v47  ;;  %v255_v49 = vld [vmem:[%s2609_s30 + $0x188] sm:$0xf]  ;;  %v257_v50 = vld [vmem:[%s2609_s30 + $0x190] sm:$0xf] }
  0x38   : > { %254 = vst [vmem:[%s2614_s3 + $0xc0] sm:$0xf] %v253_v48  ;;  %256 = vst [vmem:[%s2614_s3 + $0xc4] sm:$0xf] %v255_v49  ;;  %v259_v51 = vld [vmem:[%s2609_s30 + $0x198] sm:$0xf] }
  0x39   : > { %258 = vst [vmem:[%s2614_s3 + $0xc8] sm:$0xf] %v257_v50  ;;  %v261_v52 = vld [vmem:[%s2609_s30 + $0x1a0] sm:$0xf]  ;;  %v263_v53 = vld [vmem:[%s2609_s30 + $0x1a8] sm:$0xf] }
  0x3a   : > { %260 = vst [vmem:[%s2614_s3 + $0xcc] sm:$0xf] %v259_v51  ;;  %262 = vst [vmem:[%s2614_s3 + $0xd0] sm:$0xf] %v261_v52  ;;  %v265_v54 = vld [vmem:[%s2609_s30 + $0x1b0] sm:$0xf] }
  0x3b   : > { %264 = vst [vmem:[%s2614_s3 + $0xd4] sm:$0xf] %v263_v53  ;;  %v267_v55 = vld [vmem:[%s2609_s30 + $0x1b8] sm:$0xf]  ;;  %v269_v56 = vld [vmem:[%s2609_s30 + $0x1c0] sm:$0xf] }
  0x3c   : > { %266 = vst [vmem:[%s2614_s3 + $0xd8] sm:$0xf] %v265_v54  ;;  %268 = vst [vmem:[%s2614_s3 + $0xdc] sm:$0xf] %v267_v55  ;;  %v271_v57 = vld [vmem:[%s2609_s30 + $0x1c8] sm:$0xf] }
  0x3d   : > { %270 = vst [vmem:[%s2614_s3 + $0xe0] sm:$0xf] %v269_v56  ;;  %v273_v58 = vld [vmem:[%s2609_s30 + $0x1d0] sm:$0xf]  ;;  %v275_v59 = vld [vmem:[%s2609_s30 + $0x1d8] sm:$0xf] }
  0x3e   : > { %272 = vst [vmem:[%s2614_s3 + $0xe4] sm:$0xf] %v271_v57  ;;  %274 = vst [vmem:[%s2614_s3 + $0xe8] sm:$0xf] %v273_v58  ;;  %v277_v60 = vld [vmem:[%s2609_s30 + $0x1e0] sm:$0xf] }
  0x3f   : > { %276 = vst [vmem:[%s2614_s3 + $0xec] sm:$0xf] %v275_v59  ;;  %v279_v61 = vld [vmem:[%s2609_s30 + $0x1e8] sm:$0xf]  ;;  %v281_v62 = vld [vmem:[%s2609_s30 + $0x1f0] sm:$0xf] }
  0x40   : > { %278 = vst [vmem:[%s2614_s3 + $0xf0] sm:$0xf] %v277_v60  ;;  %280 = vst [vmem:[%s2614_s3 + $0xf4] sm:$0xf] %v279_v61  ;;  %v283_v63 = vld [vmem:[%s2609_s30 + $0x1f8] sm:$0xf] }
  0x41   : > { %282 = vst [vmem:[%s2614_s3 + $0xf8] sm:$0xf] %v281_v62  ;;  %284 = vst [vmem:[%s2614_s3 + $0xfc] sm:$0xf] %v283_v63 }
  0x42 PF: > { %p1874_p7 = scmp.ge.s32.totalorder %s2531_s15, 1  ;;  %p446_p8 = scmp.lt.s32.totalorder %s2531_s15, 99 }
  0x44   : > { %p447_p9 = pnand %p1874_p7, %p446_p8 }
  0x45   : > { %s453_s4 = sand.u32 (!%p447_p9), 1, %s2507_s9   ;;  %s1876_s5 = sshll.u32 (!%p447_p9), %s2515_s11, 4 }
  0x46   : > { %450 = sbr.rel (%p447_p9) target bundleno = 430 (0x1ae), region = 65  ;;  %s1875_s6 = sshll.u32 (!%p447_p9), %s453_s4, 8 }
  0x47   : > { %p487_p10 = scmp.lt.s32.totalorder (!%p447_p9), %s1876_s5, 31  ;;  %s1878_s7 = sshll.u32 (!%p447_p9), %s2519_s12, 6 }
  0x48   : > { %p496_p11 = scmp.lt.s32.totalorder (!%p447_p9), %s1878_s7, 3135  ;;  %s2756_s9 = scalar_lea.vmem (!%p447_p9), [#allocation3], %s1875_s6 }
  0x49   : > { %p1880_p12 = scmp.ne.s32.totalorder (!%p447_p9), %s2515_s11, 0 }
  0x4d   : > { %s2933_s5 = smov (!%p487_p10, %s1876_s5), 31  ;;  %s2935_s7 = smov (!%p496_p11, %s1878_s7), 3135 }
  0x4e   : > { %s1877_s8 = sshll.u32 %s2933_s5, 2  ;;  %s1879_s21 = sshll.u32 %s2935_s7, 2  ;;  %v2533_v0 = vmov (!%p1880_p12), 0.0  }
  0x4f   : > { %s2749_s20 = scalar_lea.vmem %s2918_s1, %s1877_s8  ;;  %s2754_s25 = scalar_lea.vmem %s2919_s2, %s1879_s21  ;;  %509 = vst [vmem:[#allocation2] sm:$0xff] (!%p1880_p12), %v2533_v0  ;;  %510 = vst [vmem:[#allocation2 + $0x8] sm:$0xff] (!%p1880_p12), %v2533_v0 }
  0x50   : > { %508 = sbr.rel (%p1880_p12) target bundleno = 111 (0x6f), region = 73  ;;  %511 = vst [vmem:[#allocation2 + $0x10] sm:$0xff] (!%p1880_p12), %v2533_v0  ;;  %512 = vst [vmem:[#allocation2 + $0x18] sm:$0xff] (!%p1880_p12), %v2533_v0 }
  0x51   : > { %513 = vst [vmem:[#allocation2 + $0x20] sm:$0xff] (!%p1880_p12), %v2533_v0  ;;  %514 = vst [vmem:[#allocation2 + $0x28] sm:$0xff] (!%p1880_p12), %v2533_v0 }
  0x52   : > { %515 = vst [vmem:[#allocation2 + $0x30] sm:$0xff] (!%p1880_p12), %v2533_v0  ;;  %516 = vst [vmem:[#allocation2 + $0x38] sm:$0xff] (!%p1880_p12), %v2533_v0 }
  0x53   : > { %517 = vst [vmem:[#allocation2 + $0x40] sm:$0xff] (!%p1880_p12), %v2533_v0  ;;  %518 = vst [vmem:[#allocation2 + $0x48] sm:$0xff] (!%p1880_p12), %v2533_v0 }
  0x54   : > { %519 = vst [vmem:[#allocation2 + $0x50] sm:$0xff] (!%p1880_p12), %v2533_v0  ;;  %520 = vst [vmem:[#allocation2 + $0x58] sm:$0xff] (!%p1880_p12), %v2533_v0 }
  0x55   : > { %521 = vst [vmem:[#allocation2 + $0x60] sm:$0xff] (!%p1880_p12), %v2533_v0  ;;  %522 = vst [vmem:[#allocation2 + $0x68] sm:$0xff] (!%p1880_p12), %v2533_v0 }
  0x56   : > { %523 = vst [vmem:[#allocation2 + $0x70] sm:$0xff] (!%p1880_p12), %v2533_v0  ;;  %524 = vst [vmem:[#allocation2 + $0x78] sm:$0xff] (!%p1880_p12), %v2533_v0 }
  0x57   : > { %525 = vst [vmem:[#allocation2 + $0x80] sm:$0xff] %v2533_v0  ;;  %526 = vst [vmem:[#allocation2 + $0x88] sm:$0xff] %v2533_v0 }
  0x58   : > { %527 = vst [vmem:[#allocation2 + $0x90] sm:$0xff] %v2533_v0  ;;  %528 = vst [vmem:[#allocation2 + $0x98] sm:$0xff] %v2533_v0 }
  0x59   : > { %529 = vst [vmem:[#allocation2 + $0xa0] sm:$0xff] %v2533_v0  ;;  %530 = vst [vmem:[#allocation2 + $0xa8] sm:$0xff] %v2533_v0 }
  0x5a   : > { %531 = vst [vmem:[#allocation2 + $0xb0] sm:$0xff] %v2533_v0  ;;  %532 = vst [vmem:[#allocation2 + $0xb8] sm:$0xff] %v2533_v0 }
  0x5b   : > { %533 = vst [vmem:[#allocation2 + $0xc0] sm:$0xff] %v2533_v0  ;;  %534 = vst [vmem:[#allocation2 + $0xc8] sm:$0xff] %v2533_v0 }
  0x5c   : > { %535 = vst [vmem:[#allocation2 + $0xd0] sm:$0xff] %v2533_v0  ;;  %536 = vst [vmem:[#allocation2 + $0xd8] sm:$0xff] %v2533_v0 }
  0x5d   : > { %537 = vst [vmem:[#allocation2 + $0xe0] sm:$0xff] %v2533_v0  ;;  %538 = vst [vmem:[#allocation2 + $0xe8] sm:$0xff] %v2533_v0 }
  0x5e   : > { %539 = vst [vmem:[#allocation2 + $0xf0] sm:$0xff] %v2533_v0  ;;  %540 = vst [vmem:[#allocation2 + $0xf8] sm:$0xff] %v2533_v0 }
  0x5f   : > { %541 = vst [vmem:[#allocation2 + $0x100] sm:$0xff] %v2533_v0  ;;  %542 = vst [vmem:[#allocation2 + $0x108] sm:$0xff] %v2533_v0 }
  0x60   : > { %543 = vst [vmem:[#allocation2 + $0x110] sm:$0xff] %v2533_v0  ;;  %544 = vst [vmem:[#allocation2 + $0x118] sm:$0xff] %v2533_v0 }
  0x61   : > { %545 = vst [vmem:[#allocation2 + $0x120] sm:$0xff] %v2533_v0  ;;  %546 = vst [vmem:[#allocation2 + $0x128] sm:$0xff] %v2533_v0 }
  0x62   : > { %547 = vst [vmem:[#allocation2 + $0x130] sm:$0xff] %v2533_v0  ;;  %548 = vst [vmem:[#allocation2 + $0x138] sm:$0xff] %v2533_v0 }
  0x63   : > { %549 = vst [vmem:[#allocation2 + $0x140] sm:$0xff] %v2533_v0  ;;  %550 = vst [vmem:[#allocation2 + $0x148] sm:$0xff] %v2533_v0 }
  0x64   : > { %551 = vst [vmem:[#allocation2 + $0x150] sm:$0xff] %v2533_v0  ;;  %552 = vst [vmem:[#allocation2 + $0x158] sm:$0xff] %v2533_v0 }
  0x65   : > { %553 = vst [vmem:[#allocation2 + $0x160] sm:$0xff] %v2533_v0  ;;  %554 = vst [vmem:[#allocation2 + $0x168] sm:$0xff] %v2533_v0 }
  0x66   : > { %555 = vst [vmem:[#allocation2 + $0x170] sm:$0xff] %v2533_v0  ;;  %556 = vst [vmem:[#allocation2 + $0x178] sm:$0xff] %v2533_v0 }
  0x67   : > { %557 = vst [vmem:[#allocation2 + $0x180] sm:$0xff] %v2533_v0  ;;  %558 = vst [vmem:[#allocation2 + $0x188] sm:$0xff] %v2533_v0 }
  0x68   : > { %559 = vst [vmem:[#allocation2 + $0x190] sm:$0xff] %v2533_v0  ;;  %560 = vst [vmem:[#allocation2 + $0x198] sm:$0xff] %v2533_v0 }
  0x69   : > { %561 = vst [vmem:[#allocation2 + $0x1a0] sm:$0xff] %v2533_v0  ;;  %562 = vst [vmem:[#allocation2 + $0x1a8] sm:$0xff] %v2533_v0 }
  0x6a   : > { %563 = vst [vmem:[#allocation2 + $0x1b0] sm:$0xff] %v2533_v0  ;;  %564 = vst [vmem:[#allocation2 + $0x1b8] sm:$0xff] %v2533_v0 }
  0x6b   : > { %565 = vst [vmem:[#allocation2 + $0x1c0] sm:$0xff] %v2533_v0  ;;  %566 = vst [vmem:[#allocation2 + $0x1c8] sm:$0xff] %v2533_v0 }
  0x6c   : > { %567 = vst [vmem:[#allocation2 + $0x1d0] sm:$0xff] %v2533_v0  ;;  %568 = vst [vmem:[#allocation2 + $0x1d8] sm:$0xff] %v2533_v0 }
  0x6d   : > { %569 = vst [vmem:[#allocation2 + $0x1e0] sm:$0xff] %v2533_v0  ;;  %570 = vst [vmem:[#allocation2 + $0x1e8] sm:$0xff] %v2533_v0 }
  0x6e   : > { %571 = vst [vmem:[#allocation2 + $0x1f0] sm:$0xff] %v2533_v0  ;;  %572 = vst [vmem:[#allocation2 + $0x1f8] sm:$0xff] %v2533_v0 }
  0x6f PF: > { %v2437_v1 = vld [vmem:[%s2749_s20] sm:$0xff]   ;;  %v2438_v2 = vld [vmem:[%s2749_s20 + $0x8] sm:$0xff]   ;;  %v2439_v3 = vld [vmem:[%s2749_s20 + $0x10] sm:$0xff]   ;;  %p1921_p13 = scmp.ne.s32.totalorder %s2515_s11, 1 }
  0x70   : > { %2284 = vmatprep.subr.bf16.mxu0 %v2437_v1  ;;  %2364 = vmatprep.subr.bf16.mxu1 %v2437_v1  ;;  %v2440_v4 = vld [vmem:[%s2749_s20 + $0x18] sm:$0xff]   ;;  %v2445_v5 = vld [vmem:[%s2756_s9] sm:$0xff]   ;;  %v2441_v7 = vld [vmem:[%s2749_s20 + $0x20] sm:$0xff]  }
  0x71   : > { %2285 = vmatpush3.bf16.msra.mxu0 %v2437_v1  ;;  %2372 = vmatpush3.bf16.msra.mxu1 %v2437_v1  ;;  %v2446_v6 = vld [vmem:[%s2756_s9 + $0x80] sm:$0xff]   ;;  %v2442_v8 = vld [vmem:[%s2749_s20 + $0x28] sm:$0xff]   ;;  %v2444_v10 = vld [vmem:[%s2749_s20 + $0x38] sm:$0xff]  }
  0x72   : > { %2286 = vmatprep.subr.bf16.mxu0 %v2438_v2  ;;  %2365 = vmatprep.subr.bf16.mxu1 %v2438_v2  ;;  %v2443_v9 = vld [vmem:[%s2749_s20 + $0x30] sm:$0xff]   ;;  %v2447_v11 = vld [vmem:[%s2756_s9 + $0x8] sm:$0xff]   ;;  %v2449_v13 = vld [vmem:[%s2756_s9 + $0x10] sm:$0xff]  }
  0x73   : > { %2300 = vmatprep.mubr.bf16.mxu0 %v2445_v5  ;;  %2332 = vmatprep.mubr.bf16.mxu1 %v2446_v6  ;;  %v2448_v12 = vld [vmem:[%s2756_s9 + $0x88] sm:$0xff]   ;;  %v2450_v14 = vld [vmem:[%s2756_s9 + $0x90] sm:$0xff]   ;;  %v2451_v15 = vld [vmem:[%s2756_s9 + $0x18] sm:$0xff]  }
  0x74   : > { %v2452_v16 = vld [vmem:[%s2756_s9 + $0x98] sm:$0xff]   ;;  %v2453_v17 = vld [vmem:[%s2756_s9 + $0x20] sm:$0xff]   ;;  %v2455_v19 = vld [vmem:[%s2756_s9 + $0x28] sm:$0xff]  }
  0x75   : > { %2287 = vmatpush3.bf16.msra.mxu0 %v2438_v2  ;;  %2373 = vmatpush3.bf16.msra.mxu1 %v2438_v2  ;;  %v2454_v18 = vld [vmem:[%s2756_s9 + $0xa0] sm:$0xff]   ;;  %v2456_v20 = vld [vmem:[%s2756_s9 + $0xa8] sm:$0xff]   ;;  %v2457_v21 = vld [vmem:[%s2756_s9 + $0x30] sm:$0xff]  }
  0x76   : > { %2288 = vmatprep.subr.bf16.mxu0 %v2439_v3  ;;  %2366 = vmatprep.subr.bf16.mxu1 %v2439_v3  ;;  %v2458_v22 = vld [vmem:[%s2756_s9 + $0xb0] sm:$0xff]   ;;  %v2459_v23 = vld [vmem:[%s2756_s9 + $0x38] sm:$0xff]   ;;  %v2461_v25 = vld [vmem:[%s2756_s9 + $0x40] sm:$0xff]  }
  0x77   : > { %v2460_v24 = vld [vmem:[%s2756_s9 + $0xb8] sm:$0xff]   ;;  %v2462_v26 = vld [vmem:[%s2756_s9 + $0xc0] sm:$0xff]   ;;  %v2463_v27 = vld [vmem:[%s2756_s9 + $0x48] sm:$0xff]  }
  0x78   : > { %v2464_v28 = vld [vmem:[%s2756_s9 + $0xc8] sm:$0xff]   ;;  %v2465_v29 = vld [vmem:[%s2756_s9 + $0x50] sm:$0xff]   ;;  %v2467_v31 = vld [vmem:[%s2756_s9 + $0x58] sm:$0xff]  }
  0x79   : > { %2289 = vmatpush3.bf16.msra.mxu0 %v2439_v3  ;;  %2374 = vmatpush3.bf16.msra.mxu1 %v2439_v3  ;;  %v2466_v30 = vld [vmem:[%s2756_s9 + $0xd0] sm:$0xff]   ;;  %v2468_v32 = vld [vmem:[%s2756_s9 + $0xd8] sm:$0xff]   ;;  %v2469_v33 = vld [vmem:[%s2756_s9 + $0x60] sm:$0xff]  }
  0x7a   : > { %2290 = vmatprep.subr.bf16.mxu0 %v2440_v4  ;;  %2367 = vmatprep.subr.bf16.mxu1 %v2440_v4  ;;  %v2470_v34 = vld [vmem:[%s2756_s9 + $0xe0] sm:$0xff]   ;;  %v2471_v35 = vld [vmem:[%s2756_s9 + $0x68] sm:$0xff]   ;;  %v2473_v37 = vld [vmem:[%s2756_s9 + $0x70] sm:$0xff]  }
  0x7b   : > { %v2472_v36 = vld [vmem:[%s2756_s9 + $0xe8] sm:$0xff]   ;;  %v2474_v38 = vld [vmem:[%s2756_s9 + $0xf0] sm:$0xff]   ;;  %v2475_v39 = vld [vmem:[%s2756_s9 + $0x78] sm:$0xff]  }
  0x7c   : > { %v2476_v40 = vld [vmem:[%s2756_s9 + $0xf8] sm:$0xff]   ;;  %v575_v41 = vld [vmem:[#allocation2 + $0x10] sm:$0xff]  ;;  %v573_v43 = vld [vmem:[#allocation2] sm:$0xff] }
  0x7d   : > { %2291 = vmatpush3.bf16.msra.mxu0 %v2440_v4  ;;  %2375 = vmatpush3.bf16.msra.mxu1 %v2440_v4  ;;  %v607_v42 = vld [vmem:[#allocation2 + $0x110] sm:$0xff]  ;;  %v605_v44 = vld [vmem:[#allocation2 + $0x100] sm:$0xff]  ;;  %v576_v47 = vld [vmem:[#allocation2 + $0x18] sm:$0xff] }
  0x7e   : > { %2292 = vmatprep.subr.bf16.mxu0 %v2441_v7  ;;  %2368 = vmatprep.subr.bf16.mxu1 %v2441_v7  ;;  %v608_v48 = vld [vmem:[#allocation2 + $0x118] sm:$0xff]  ;;  %v574_v53 = vld [vmem:[#allocation2 + $0x8] sm:$0xff]  ;;  %v579_v1 = vld [vmem:[#allocation2 + $0x30] sm:$0xff] }
  0x7f   : > { %v606_v54 = vld [vmem:[#allocation2 + $0x108] sm:$0xff]  ;;  %v611_v2 = vld [vmem:[#allocation2 + $0x130] sm:$0xff]  ;;  %v577_v3 = vld [vmem:[#allocation2 + $0x20] sm:$0xff] }
  0x80   : > { %v609_v4 = vld [vmem:[#allocation2 + $0x120] sm:$0xff] }
  0x81   : > { %2293 = vmatpush3.bf16.msra.mxu0 %v2441_v7  ;;  %2376 = vmatpush3.bf16.msra.mxu1 %v2441_v7  ;;  %v580_v7 = vld [vmem:[#allocation2 + $0x38] sm:$0xff] }
  0x82   : > { %2294 = vmatprep.subr.bf16.mxu0 %v2442_v8  ;;  %2369 = vmatprep.subr.bf16.mxu1 %v2442_v8 }
  0x85   : > { %2295 = vmatpush3.bf16.msra.mxu0 %v2442_v8  ;;  %2377 = vmatpush3.bf16.msra.mxu1 %v2442_v8  ;;  %v612_v8 = vld [vmem:[#allocation2 + $0x138] sm:$0xff] }
  0x86   : > { %2296 = vmatprep.subr.bf16.mxu0 %v2443_v9  ;;  %2370 = vmatprep.subr.bf16.mxu1 %v2443_v9 }
  0x89   : > { %2297 = vmatpush3.bf16.msra.mxu0 %v2443_v9  ;;  %2378 = vmatpush3.bf16.msra.mxu1 %v2443_v9 }
  0x8a   : > { %2298 = vmatprep.subr.bf16.mxu0 %v2444_v10  ;;  %2371 = vmatprep.subr.bf16.mxu1 %v2444_v10 }
  0x8d   : > { %2299 = vmatpush3.bf16.msra.mxu0 %v2444_v10  ;;  %2379 = vmatpush3.bf16.msra.mxu1 %v2444_v10 }
  0x90   : > { %2301 = vmatmul.mubr.bf16.vlgmr.msra.gmra.mrb[0].mxu0 %v2447_v11  ;;  %2333 = vmatmul.mubr.bf16.vlgmr.msra.gmra.mrb[0].mxu1 %v2448_v12 }
  0x91   : > { %2304 = vmatprep.mubr.bf16.mxu0 %v2449_v13  ;;  %2336 = vmatprep.mubr.bf16.mxu1 %v2450_v14  ;;  %v578_v13 = vld [vmem:[#allocation2 + $0x28] sm:$0xff] }
  0x92   : > { %v610_v14 = vld [vmem:[#allocation2 + $0x128] sm:$0xff] }
  0x98   : > { %2305 = vmatmul.mubr.bf16.gmra.mrb[4].mxu0 %v2451_v15  ;;  %2337 = vmatmul.mubr.bf16.gmra.mrb[4].mxu1 %v2452_v16 }
  0x99   : > { %2308 = vmatprep.mubr.bf16.mxu0 %v2453_v17  ;;  %2340 = vmatprep.mubr.bf16.mxu1 %v2454_v18 }
  0xa0   : > { %2309 = vmatmul.mubr.bf16.gmra.mrb[8].mxu0 %v2455_v19  ;;  %2341 = vmatmul.mubr.bf16.gmra.mrb[8].mxu1 %v2456_v20 }
  0xa1   : > { %2312 = vmatprep.mubr.bf16.mxu0 %v2457_v21  ;;  %2344 = vmatprep.mubr.bf16.mxu1 %v2458_v22 }
  0xa8   : > { %2313 = vmatmul.mubr.bf16.gmra.mrb[12].mxu0 %v2459_v23  ;;  %2345 = vmatmul.mubr.bf16.gmra.mrb[12].mxu1 %v2460_v24 }
  0xa9   : > { %2316 = vmatprep.mubr.bf16.mxu0 %v2461_v25  ;;  %2348 = vmatprep.mubr.bf16.mxu1 %v2462_v26  ;;  %v583_v25 = vld [vmem:[#allocation2 + $0x50] sm:$0xff] }
  0xaa   : > { %v615_v26 = vld [vmem:[#allocation2 + $0x150] sm:$0xff] }
  0xb0   : > { %2317 = vmatmul.mubr.bf16.gmra.mrb[16].mxu0 %v2463_v27  ;;  %2349 = vmatmul.mubr.bf16.gmra.mrb[16].mxu1 %v2464_v28  ;;  %v581_v27 = vld [vmem:[#allocation2 + $0x40] sm:$0xff] }
  0xb1   : > { %2320 = vmatprep.mubr.bf16.mxu0 %v2465_v29  ;;  %2352 = vmatprep.mubr.bf16.mxu1 %v2466_v30  ;;  %v613_v28 = vld [vmem:[#allocation2 + $0x140] sm:$0xff] }
  0xb8   : > { %2321 = vmatmul.mubr.bf16.gmra.mrb[20].mxu0 %v2467_v31  ;;  %2353 = vmatmul.mubr.bf16.gmra.mrb[20].mxu1 %v2468_v32  ;;  %v584_v31 = vld [vmem:[#allocation2 + $0x58] sm:$0xff] }
  0xb9   : > { %2324 = vmatprep.mubr.bf16.mxu0 %v2469_v33  ;;  %2356 = vmatprep.mubr.bf16.mxu1 %v2470_v34  ;;  %v616_v32 = vld [vmem:[#allocation2 + $0x158] sm:$0xff] }
  0xc0   : > { %2325 = vmatmul.mubr.bf16.gmra.mrb[24].mxu0 %v2471_v35  ;;  %2357 = vmatmul.mubr.bf16.gmra.mrb[24].mxu1 %v2472_v36 }
  0xc1   : > { %2328 = vmatprep.mubr.bf16.mxu0 %v2473_v37  ;;  %2360 = vmatprep.mubr.bf16.mxu1 %v2474_v38  ;;  %v582_v37 = vld [vmem:[#allocation2 + $0x48] sm:$0xff] }
  0xc2   : > { %v614_v38 = vld [vmem:[#allocation2 + $0x148] sm:$0xff] }
  0xc8   : > { %2329 = vmatmul.mubr.bf16.gmra.mrb[28].mxu0 %v2475_v39  ;;  %2361 = vmatmul.mubr.bf16.gmra.mrb[28].mxu1 %v2476_v40 }
 0x163   : > { %v2302_v45 = vpop.f32.mrb[0].mxu0  ;;  %v2334_v46 = vpop.f32.mrb[0].mxu1 }
 0x164   : > { %v1248_v49 = vadd.f32 %v2302_v45, %v575_v41  ;;  %v1280_v50 = vadd.f32 %v2334_v46, %v607_v42  ;;  %v991_v51 = vpop.f32.mrb[1].mxu0  ;;  %v1119_v52 = vpop.f32.mrb[1].mxu1 }
 0x165   : > { %v1246_v55 = vadd.f32 %v991_v51, %v573_v43  ;;  %v1278_v56 = vadd.f32 %v1119_v52, %v605_v44  ;;  %v2303_v57 = vpop.f32.mrb[2].mxu0  ;;  %v2335_v58 = vpop.f32.mrb[2].mxu1  ;;  %v585_v51 = vld [vmem:[#allocation2 + $0x60] sm:$0xff] }
 0x166   : > { %1312 = vst [vmem:[#allocation2 + $0x10] sm:$0xff] %v1248_v49  ;;  %1344 = vst [vmem:[#allocation2 + $0x110] sm:$0xff] %v1280_v50  ;;  %v1249_v59 = vadd.f32 %v2303_v57, %v576_v47  ;;  %v1281_v60 = vadd.f32 %v2335_v58, %v608_v48  ;;  %v994_v61 = vpop.f32.mrb[3].mxu0  ;;  %v1122_v62 = vpop.f32.mrb[3].mxu1  ;;  %v587_v49 = vld [vmem:[#allocation2 + $0x70] sm:$0xff]  ;;  %v617_v52 = vld [vmem:[#allocation2 + $0x160] sm:$0xff] }
 0x167   : > { %1310 = vst [vmem:[#allocation2] sm:$0xff] %v1246_v55  ;;  %1342 = vst [vmem:[#allocation2 + $0x100] sm:$0xff] %v1278_v56  ;;  %v1247_v63 = vadd.f32 %v994_v61, %v574_v53  ;;  %v1279_v0 = vadd.f32 %v1122_v62, %v606_v54  ;;  %v619_v50 = vld [vmem:[#allocation2 + $0x170] sm:$0xff]  ;;  %v588_v55 = vld [vmem:[#allocation2 + $0x78] sm:$0xff] }
 0x168   : > { %1313 = vst [vmem:[#allocation2 + $0x18] sm:$0xff] %v1249_v59  ;;  %1345 = vst [vmem:[#allocation2 + $0x118] sm:$0xff] %v1281_v60  ;;  %v620_v56 = vld [vmem:[#allocation2 + $0x178] sm:$0xff]  ;;  %v586_v61 = vld [vmem:[#allocation2 + $0x68] sm:$0xff] }
 0x169   : > { %1311 = vst [vmem:[#allocation2 + $0x8] sm:$0xff] %v1247_v63  ;;  %1343 = vst [vmem:[#allocation2 + $0x108] sm:$0xff] %v1279_v0  ;;  %v618_v62 = vld [vmem:[#allocation2 + $0x168] sm:$0xff] }
 0x16b   : > { %v2306_v5 = vpop.f32.mrb[4].mxu0  ;;  %v2338_v6 = vpop.f32.mrb[4].mxu1 }
 0x16c   : > { %v1252_v9 = vadd.f32 %v2306_v5, %v579_v1  ;;  %v1284_v10 = vadd.f32 %v2338_v6, %v611_v2  ;;  %v1007_v11 = vpop.f32.mrb[5].mxu0  ;;  %v1135_v12 = vpop.f32.mrb[5].mxu1 }
 0x16d   : > { %v1250_v15 = vadd.f32 %v1007_v11, %v577_v3  ;;  %v1282_v16 = vadd.f32 %v1135_v12, %v609_v4  ;;  %v2307_v17 = vpop.f32.mrb[6].mxu0  ;;  %v2339_v18 = vpop.f32.mrb[6].mxu1  ;;  %v589_v11 = vld [vmem:[#allocation2 + $0x80] sm:$0xff] }
 0x16e   : > { %1316 = vst [vmem:[#allocation2 + $0x30] sm:$0xff] %v1252_v9  ;;  %1348 = vst [vmem:[#allocation2 + $0x130] sm:$0xff] %v1284_v10  ;;  %v1253_v19 = vadd.f32 %v2307_v17, %v580_v7  ;;  %v1285_v20 = vadd.f32 %v2339_v18, %v612_v8  ;;  %v1010_v21 = vpop.f32.mrb[7].mxu0  ;;  %v1138_v22 = vpop.f32.mrb[7].mxu1  ;;  %v591_v9 = vld [vmem:[#allocation2 + $0x90] sm:$0xff]  ;;  %v621_v12 = vld [vmem:[#allocation2 + $0x180] sm:$0xff] }
 0x16f   : > { %1314 = vst [vmem:[#allocation2 + $0x20] sm:$0xff] %v1250_v15  ;;  %1346 = vst [vmem:[#allocation2 + $0x120] sm:$0xff] %v1282_v16  ;;  %v1251_v23 = vadd.f32 %v1010_v21, %v578_v13  ;;  %v1283_v24 = vadd.f32 %v1138_v22, %v610_v14  ;;  %v623_v10 = vld [vmem:[#allocation2 + $0x190] sm:$0xff]  ;;  %v592_v15 = vld [vmem:[#allocation2 + $0x98] sm:$0xff] }
 0x170   : > { %1317 = vst [vmem:[#allocation2 + $0x38] sm:$0xff] %v1253_v19  ;;  %1349 = vst [vmem:[#allocation2 + $0x138] sm:$0xff] %v1285_v20  ;;  %v624_v16 = vld [vmem:[#allocation2 + $0x198] sm:$0xff]  ;;  %v590_v21 = vld [vmem:[#allocation2 + $0x88] sm:$0xff] }
 0x171   : > { %1315 = vst [vmem:[#allocation2 + $0x28] sm:$0xff] %v1251_v23  ;;  %1347 = vst [vmem:[#allocation2 + $0x128] sm:$0xff] %v1283_v24  ;;  %v622_v22 = vld [vmem:[#allocation2 + $0x188] sm:$0xff] }
 0x173   : > { %v2310_v29 = vpop.f32.mrb[8].mxu0  ;;  %v2342_v30 = vpop.f32.mrb[8].mxu1 }
 0x174   : > { %v1256_v33 = vadd.f32 %v2310_v29, %v583_v25  ;;  %v1288_v34 = vadd.f32 %v2342_v30, %v615_v26  ;;  %v1023_v35 = vpop.f32.mrb[9].mxu0  ;;  %v1151_v36 = vpop.f32.mrb[9].mxu1 }
 0x175   : > { %v1254_v39 = vadd.f32 %v1023_v35, %v581_v27  ;;  %v1286_v40 = vadd.f32 %v1151_v36, %v613_v28  ;;  %v2311_v41 = vpop.f32.mrb[10].mxu0  ;;  %v2343_v42 = vpop.f32.mrb[10].mxu1  ;;  %v593_v35 = vld [vmem:[#allocation2 + $0xa0] sm:$0xff] }
 0x176   : > { %1320 = vst [vmem:[#allocation2 + $0x50] sm:$0xff] %v1256_v33  ;;  %1352 = vst [vmem:[#allocation2 + $0x150] sm:$0xff] %v1288_v34  ;;  %v1257_v43 = vadd.f32 %v2311_v41, %v584_v31  ;;  %v1289_v44 = vadd.f32 %v2343_v42, %v616_v32  ;;  %v1026_v45 = vpop.f32.mrb[11].mxu0  ;;  %v1154_v46 = vpop.f32.mrb[11].mxu1  ;;  %v595_v33 = vld [vmem:[#allocation2 + $0xb0] sm:$0xff]  ;;  %v625_v36 = vld [vmem:[#allocation2 + $0x1a0] sm:$0xff] }
 0x177   : > { %1318 = vst [vmem:[#allocation2 + $0x40] sm:$0xff] %v1254_v39  ;;  %1350 = vst [vmem:[#allocation2 + $0x140] sm:$0xff] %v1286_v40  ;;  %v1255_v47 = vadd.f32 %v1026_v45, %v582_v37  ;;  %v1287_v48 = vadd.f32 %v1154_v46, %v614_v38  ;;  %v627_v34 = vld [vmem:[#allocation2 + $0x1b0] sm:$0xff]  ;;  %v596_v39 = vld [vmem:[#allocation2 + $0xb8] sm:$0xff] }
 0x178   : > { %1321 = vst [vmem:[#allocation2 + $0x58] sm:$0xff] %v1257_v43  ;;  %1353 = vst [vmem:[#allocation2 + $0x158] sm:$0xff] %v1289_v44  ;;  %v628_v40 = vld [vmem:[#allocation2 + $0x1b8] sm:$0xff]  ;;  %v594_v45 = vld [vmem:[#allocation2 + $0xa8] sm:$0xff] }
 0x179   : > { %1319 = vst [vmem:[#allocation2 + $0x48] sm:$0xff] %v1255_v47  ;;  %1351 = vst [vmem:[#allocation2 + $0x148] sm:$0xff] %v1287_v48  ;;  %v626_v46 = vld [vmem:[#allocation2 + $0x1a8] sm:$0xff] }
 0x17b   : > { %v2314_v53 = vpop.f32.mrb[12].mxu0  ;;  %v2346_v54 = vpop.f32.mrb[12].mxu1 }
 0x17c   : > { %v1260_v57 = vadd.f32 %v2314_v53, %v587_v49  ;;  %v1292_v58 = vadd.f32 %v2346_v54, %v619_v50  ;;  %v1039_v59 = vpop.f32.mrb[13].mxu0  ;;  %v1167_v60 = vpop.f32.mrb[13].mxu1 }
 0x17d   : > { %v1258_v63 = vadd.f32 %v1039_v59, %v585_v51  ;;  %v1290_v0 = vadd.f32 %v1167_v60, %v617_v52  ;;  %v2315_v1 = vpop.f32.mrb[14].mxu0  ;;  %v2347_v2 = vpop.f32.mrb[14].mxu1  ;;  %v597_v59 = vld [vmem:[#allocation2 + $0xc0] sm:$0xff] }
 0x17e   : > { %1324 = vst [vmem:[#allocation2 + $0x70] sm:$0xff] %v1260_v57  ;;  %1356 = vst [vmem:[#allocation2 + $0x170] sm:$0xff] %v1292_v58  ;;  %v1261_v3 = vadd.f32 %v2315_v1, %v588_v55  ;;  %v1293_v4 = vadd.f32 %v2347_v2, %v620_v56  ;;  %v1042_v5 = vpop.f32.mrb[15].mxu0  ;;  %v1170_v6 = vpop.f32.mrb[15].mxu1  ;;  %v599_v57 = vld [vmem:[#allocation2 + $0xd0] sm:$0xff]  ;;  %v629_v60 = vld [vmem:[#allocation2 + $0x1c0] sm:$0xff] }
 0x17f   : > { %1322 = vst [vmem:[#allocation2 + $0x60] sm:$0xff] %v1258_v63  ;;  %1354 = vst [vmem:[#allocation2 + $0x160] sm:$0xff] %v1290_v0  ;;  %v1259_v7 = vadd.f32 %v1042_v5, %v586_v61  ;;  %v1291_v8 = vadd.f32 %v1170_v6, %v618_v62  ;;  %v631_v58 = vld [vmem:[#allocation2 + $0x1d0] sm:$0xff]  ;;  %v600_v63 = vld [vmem:[#allocation2 + $0xd8] sm:$0xff] }
 0x180   : > { %1325 = vst [vmem:[#allocation2 + $0x78] sm:$0xff] %v1261_v3  ;;  %1357 = vst [vmem:[#allocation2 + $0x178] sm:$0xff] %v1293_v4  ;;  %v632_v0 = vld [vmem:[#allocation2 + $0x1d8] sm:$0xff]  ;;  %v598_v5 = vld [vmem:[#allocation2 + $0xc8] sm:$0xff] }
 0x181   : > { %1323 = vst [vmem:[#allocation2 + $0x68] sm:$0xff] %v1259_v7  ;;  %1355 = vst [vmem:[#allocation2 + $0x168] sm:$0xff] %v1291_v8  ;;  %v630_v6 = vld [vmem:[#allocation2 + $0x1c8] sm:$0xff] }
 0x183   : > { %v2318_v13 = vpop.f32.mrb[16].mxu0  ;;  %v2350_v14 = vpop.f32.mrb[16].mxu1 }
 0x184   : > { %v1264_v17 = vadd.f32 %v2318_v13, %v591_v9  ;;  %v1296_v18 = vadd.f32 %v2350_v14, %v623_v10  ;;  %v1055_v19 = vpop.f32.mrb[17].mxu0  ;;  %v1183_v20 = vpop.f32.mrb[17].mxu1 }
 0x185   : > { %v1262_v23 = vadd.f32 %v1055_v19, %v589_v11  ;;  %v1294_v24 = vadd.f32 %v1183_v20, %v621_v12  ;;  %v2319_v25 = vpop.f32.mrb[18].mxu0  ;;  %v2351_v26 = vpop.f32.mrb[18].mxu1  ;;  %v601_v19 = vld [vmem:[#allocation2 + $0xe0] sm:$0xff] }
 0x186   : > { %1328 = vst [vmem:[#allocation2 + $0x90] sm:$0xff] %v1264_v17  ;;  %1360 = vst [vmem:[#allocation2 + $0x190] sm:$0xff] %v1296_v18  ;;  %v1265_v27 = vadd.f32 %v2319_v25, %v592_v15  ;;  %v1297_v28 = vadd.f32 %v2351_v26, %v624_v16  ;;  %v1058_v29 = vpop.f32.mrb[19].mxu0  ;;  %v1186_v30 = vpop.f32.mrb[19].mxu1  ;;  %v603_v17 = vld [vmem:[#allocation2 + $0xf0] sm:$0xff]  ;;  %v633_v20 = vld [vmem:[#allocation2 + $0x1e0] sm:$0xff] }
 0x187   : > { %1326 = vst [vmem:[#allocation2 + $0x80] sm:$0xff] %v1262_v23  ;;  %1358 = vst [vmem:[#allocation2 + $0x180] sm:$0xff] %v1294_v24  ;;  %v1263_v31 = vadd.f32 %v1058_v29, %v590_v21  ;;  %v1295_v32 = vadd.f32 %v1186_v30, %v622_v22  ;;  %v635_v18 = vld [vmem:[#allocation2 + $0x1f0] sm:$0xff]  ;;  %v604_v23 = vld [vmem:[#allocation2 + $0xf8] sm:$0xff] }
 0x188   : > { %1329 = vst [vmem:[#allocation2 + $0x98] sm:$0xff] %v1265_v27  ;;  %1361 = vst [vmem:[#allocation2 + $0x198] sm:$0xff] %v1297_v28  ;;  %v636_v24 = vld [vmem:[#allocation2 + $0x1f8] sm:$0xff]  ;;  %v602_v29 = vld [vmem:[#allocation2 + $0xe8] sm:$0xff] }
 0x189   : > { %1327 = vst [vmem:[#allocation2 + $0x88] sm:$0xff] %v1263_v31  ;;  %1359 = vst [vmem:[#allocation2 + $0x188] sm:$0xff] %v1295_v32  ;;  %v634_v30 = vld [vmem:[#allocation2 + $0x1e8] sm:$0xff] }
 0x18b   : > { %v2322_v37 = vpop.f32.mrb[20].mxu0  ;;  %v2354_v38 = vpop.f32.mrb[20].mxu1 }
 0x18c   : > { %v1268_v41 = vadd.f32 %v2322_v37, %v595_v33  ;;  %v1300_v42 = vadd.f32 %v2354_v38, %v627_v34  ;;  %v1071_v43 = vpop.f32.mrb[21].mxu0  ;;  %v1199_v44 = vpop.f32.mrb[21].mxu1 }
 0x18d   : > { %v1266_v47 = vadd.f32 %v1071_v43, %v593_v35  ;;  %v1298_v48 = vadd.f32 %v1199_v44, %v625_v36  ;;  %v2323_v49 = vpop.f32.mrb[22].mxu0  ;;  %v2355_v50 = vpop.f32.mrb[22].mxu1  ;;  %v1380_v43 = vld [vmem:[#allocation2 + $0x10] sm:$0xff] (!%p1921_p13) }
 0x18e   : > { %1332 = vst [vmem:[#allocation2 + $0xb0] sm:$0xff] %v1268_v41  ;;  %1364 = vst [vmem:[#allocation2 + $0x1b0] sm:$0xff] %v1300_v42  ;;  %v1269_v51 = vadd.f32 %v2323_v49, %v596_v39  ;;  %v1301_v52 = vadd.f32 %v2355_v50, %v628_v40  ;;  %v1074_v53 = vpop.f32.mrb[23].mxu0  ;;  %v1202_v54 = vpop.f32.mrb[23].mxu1  ;;  %v1378_v41 = vld [vmem:[#allocation2] sm:$0xff] (!%p1921_p13)  ;;  %v1379_v42 = vld [vmem:[#allocation2 + $0x8] sm:$0xff] (!%p1921_p13) }
 0x18f   : > { %1330 = vst [vmem:[#allocation2 + $0xa0] sm:$0xff] %v1266_v47  ;;  %1362 = vst [vmem:[#allocation2 + $0x1a0] sm:$0xff] %v1298_v48  ;;  %v1267_v55 = vadd.f32 %v1074_v53, %v594_v45  ;;  %v1299_v56 = vadd.f32 %v1202_v54, %v626_v46  ;;  %v2056_v44 = vpack.c.bf16 (!%p1921_p13), %v1379_v42, %v1378_v41  ;;  %v1381_v45 = vld [vmem:[#allocation2 + $0x18] sm:$0xff] (!%p1921_p13)  ;;  %v1382_v46 = vld [vmem:[#allocation2 + $0x20] sm:$0xff] (!%p1921_p13) }
 0x190   : > { %1333 = vst [vmem:[#allocation2 + $0xb8] sm:$0xff] %v1269_v51  ;;  %1365 = vst [vmem:[#allocation2 + $0x1b8] sm:$0xff] %v1301_v52  ;;  %v1383_v47 = vld [vmem:[#allocation2 + $0x28] sm:$0xff] (!%p1921_p13)  ;;  %v2061_v48 = vpack.c.bf16 (!%p1921_p13), %v1381_v45, %v1380_v43  ;;  %v1384_v50 = vld [vmem:[#allocation2 + $0x30] sm:$0xff] (!%p1921_p13) }
 0x191   : > { %1331 = vst [vmem:[#allocation2 + $0xa8] sm:$0xff] %v1267_v55  ;;  %1363 = vst [vmem:[#allocation2 + $0x1a8] sm:$0xff] %v1299_v56  ;;  %v2066_v49 = vpack.c.bf16 (!%p1921_p13), %v1383_v47, %v1382_v46  ;;  %v1385_v51 = vld [vmem:[#allocation2 + $0x38] sm:$0xff] (!%p1921_p13)  ;;  %v1386_v52 = vld [vmem:[#allocation2 + $0x40] sm:$0xff] (!%p1921_p13) }
 0x192   : > { %2057 = vst [vmem:[%s2754_s25] sm:$0xff] (!%p1921_p13), %v2056_v44   ;;  %v2071_v53 = vpack.c.bf16 (!%p1921_p13), %v1385_v51, %v1384_v50  ;;  %v1387_v54 = vld [vmem:[#allocation2 + $0x48] sm:$0xff] (!%p1921_p13)  ;;  %v1388_v55 = vld [vmem:[#allocation2 + $0x50] sm:$0xff] (!%p1921_p13)  ;;  %v1389_v56 = vld [vmem:[#allocation2 + $0x58] sm:$0xff] (!%p1921_p13) }
 0x193   : > { %v2326_v61 = vpop.f32.mrb[24].mxu0  ;;  %v2358_v62 = vpop.f32.mrb[24].mxu1  ;;  %2213 = vst [vmem:[%s2754_s25 + $0x8] sm:$0xff] (!%p1921_p13), %v2061_v48   ;;  %2214 = vst [vmem:[%s2754_s25 + $0x10] sm:$0xff] (!%p1921_p13), %v2066_v49   ;;  %v1421_v41 = vld [vmem:[#allocation2 + $0x158] sm:$0xff] (!%p1921_p13)  ;;  %v1422_v42 = vld [vmem:[#allocation2 + $0x160] sm:$0xff] (!%p1921_p13) }
 0x194   : > { %v1272_v1 = vadd.f32 %v2326_v61, %v599_v57  ;;  %v1304_v2 = vadd.f32 %v2358_v62, %v631_v58  ;;  %v1087_v3 = vpop.f32.mrb[25].mxu0  ;;  %v1215_v4 = vpop.f32.mrb[25].mxu1  ;;  %v2076_v57 = vpack.c.bf16 (!%p1921_p13), %v1387_v54, %v1386_v52  ;;  %v2081_v58 = vpack.c.bf16 (!%p1921_p13), %v1389_v56, %v1388_v55  ;;  %v1392_v61 = vld [vmem:[#allocation2 + $0x70] sm:$0xff] (!%p1921_p13)  ;;  %2215 = vst [vmem:[%s2754_s25 + $0x18] sm:$0xff] (!%p1921_p13), %v2071_v53   ;;  %v1423_v44 = vld [vmem:[#allocation2 + $0x168] sm:$0xff] (!%p1921_p13)  ;;  %v1425_v46 = vld [vmem:[#allocation2 + $0x178] sm:$0xff] (!%p1921_p13) }
 0x195   : > { %v1270_v7 = vadd.f32 %v1087_v3, %v597_v59  ;;  %v1302_v8 = vadd.f32 %v1215_v4, %v629_v60  ;;  %v2327_v9 = vpop.f32.mrb[26].mxu0  ;;  %v2359_v10 = vpop.f32.mrb[26].mxu1  ;;  %v1390_v59 = vld [vmem:[#allocation2 + $0x60] sm:$0xff] (!%p1921_p13)  ;;  %v1391_v60 = vld [vmem:[#allocation2 + $0x68] sm:$0xff] (!%p1921_p13)  ;;  %v1396_v4 = vld [vmem:[#allocation2 + $0x90] sm:$0xff] (!%p1921_p13)  ;;  %v2166_v47 = vpack.c.bf16 (!%p1921_p13), %v1423_v44, %v1422_v42 }
 0x196   : > { %1336 = vst [vmem:[#allocation2 + $0xd0] sm:$0xff] %v1272_v1  ;;  %1368 = vst [vmem:[#allocation2 + $0x1d0] sm:$0xff] %v1304_v2  ;;  %v1273_v11 = vadd.f32 %v2327_v9, %v600_v63  ;;  %v1305_v12 = vadd.f32 %v2359_v10, %v632_v0  ;;  %v1090_v13 = vpop.f32.mrb[27].mxu0  ;;  %v1218_v14 = vpop.f32.mrb[27].mxu1  ;;  %v2086_v62 = vpack.c.bf16 (!%p1921_p13), %v1391_v60, %v1390_v59  ;;  %v1393_v63 = vld [vmem:[#allocation2 + $0x78] sm:$0xff] (!%p1921_p13)  ;;  %v1394_v0 = vld [vmem:[#allocation2 + $0x80] sm:$0xff] (!%p1921_p13) }
 0x197   : > { %1334 = vst [vmem:[#allocation2 + $0xc0] sm:$0xff] %v1270_v7  ;;  %1366 = vst [vmem:[#allocation2 + $0x1c0] sm:$0xff] %v1302_v8  ;;  %v1271_v15 = vadd.f32 %v1090_v13, %v598_v5  ;;  %v1303_v16 = vadd.f32 %v1218_v14, %v630_v6  ;;  %v1395_v1 = vld [vmem:[#allocation2 + $0x88] sm:$0xff] (!%p1921_p13)  ;;  %v2091_v2 = vpack.c.bf16 (!%p1921_p13), %v1393_v63, %v1392_v61  ;;  %v1397_v5 = vld [vmem:[#allocation2 + $0x98] sm:$0xff] (!%p1921_p13) }
 0x198   : > { %1337 = vst [vmem:[#allocation2 + $0xd8] sm:$0xff] %v1273_v11  ;;  %1369 = vst [vmem:[#allocation2 + $0x1d8] sm:$0xff] %v1305_v12  ;;  %v2096_v3 = vpack.c.bf16 (!%p1921_p13), %v1395_v1, %v1394_v0  ;;  %v1398_v6 = vld [vmem:[#allocation2 + $0xa0] sm:$0xff] (!%p1921_p13)  ;;  %v2101_v7 = vpack.c.bf16 (!%p1921_p13), %v1397_v5, %v1396_v4  ;;  %v1399_v8 = vld [vmem:[#allocation2 + $0xa8] sm:$0xff] (!%p1921_p13) }
 0x199   : > { %1335 = vst [vmem:[#allocation2 + $0xc8] sm:$0xff] %v1271_v15  ;;  %1367 = vst [vmem:[#allocation2 + $0x1c8] sm:$0xff] %v1303_v16  ;;  %v1400_v9 = vld [vmem:[#allocation2 + $0xb0] sm:$0xff] (!%p1921_p13)  ;;  %v1401_v10 = vld [vmem:[#allocation2 + $0xb8] sm:$0xff] (!%p1921_p13)  ;;  %v2106_v11 = vpack.c.bf16 (!%p1921_p13), %v1399_v8, %v1398_v6 }
 0x19a   : > { %2216 = vst [vmem:[%s2754_s25 + $0x20] sm:$0xff] (!%p1921_p13), %v2076_v57   ;;  %2217 = vst [vmem:[%s2754_s25 + $0x28] sm:$0xff] (!%p1921_p13), %v2081_v58   ;;  %v2111_v12 = vpack.c.bf16 (!%p1921_p13), %v1401_v10, %v1400_v9  ;;  %v1424_v45 = vld [vmem:[#allocation2 + $0x170] sm:$0xff] (!%p1921_p13)  ;;  %v1426_v49 = vld [vmem:[#allocation2 + $0x180] sm:$0xff] (!%p1921_p13) }
 0x19b   : > { %v2330_v21 = vpop.f32.mrb[28].mxu0  ;;  %v2362_v22 = vpop.f32.mrb[28].mxu1  ;;  %1377 = sbr.rel (%p1921_p13) target bundleno = 430 (0x1ae), region = 77  ;;  %2218 = vst [vmem:[%s2754_s25 + $0x30] sm:$0xff] (!%p1921_p13), %v2086_v62   ;;  %2219 = vst [vmem:[%s2754_s25 + $0x38] sm:$0xff] (!%p1921_p13), %v2091_v2   ;;  %v2171_v48 = vpack.c.bf16 (!%p1921_p13), %v1425_v46, %v1424_v45  ;;  %v1427_v50 = vld [vmem:[#allocation2 + $0x188] sm:$0xff] (!%p1921_p13) }
 0x19c   : > { %v1276_v25 = vadd.f32 %v2330_v21, %v603_v17  ;;  %v1308_v26 = vadd.f32 %v2362_v22, %v635_v18  ;;  %v1103_v27 = vpop.f32.mrb[29].mxu0  ;;  %v1231_v28 = vpop.f32.mrb[29].mxu1  ;;  %2220 = vst [vmem:[%s2754_s25 + $0x40] sm:$0xff] (!%p1921_p13), %v2096_v3   ;;  %2221 = vst [vmem:[%s2754_s25 + $0x48] sm:$0xff] (!%p1921_p13), %v2101_v7   ;;  %v1428_v51 = vld [vmem:[#allocation2 + $0x190] sm:$0xff] (!%p1921_p13)  ;;  %v2176_v52 = vpack.c.bf16 (!%p1921_p13), %v1427_v50, %v1426_v49  ;;  %v1429_v53 = vld [vmem:[#allocation2 + $0x198] sm:$0xff] (!%p1921_p13) }
 0x19d   : > { %v1274_v31 = vadd.f32 %v1103_v27, %v601_v19  ;;  %v1306_v32 = vadd.f32 %v1231_v28, %v633_v20  ;;  %v2331_v33 = vpop.f32.mrb[30].mxu0  ;;  %v2363_v34 = vpop.f32.mrb[30].mxu1  ;;  %v1404_v15 = vld [vmem:[#allocation2 + $0xd0] sm:$0xff] (!%p1921_p13)  ;;  %2222 = vst [vmem:[%s2754_s25 + $0x50] sm:$0xff] (!%p1921_p13), %v2106_v11   ;;  %2223 = vst [vmem:[%s2754_s25 + $0x58] sm:$0xff] (!%p1921_p13), %v2111_v12   ;;  %v1413_v28 = vld [vmem:[#allocation2 + $0x118] sm:$0xff] (!%p1921_p13)  ;;  %v2181_v56 = vpack.c.bf16 (!%p1921_p13), %v1429_v53, %v1428_v51 }
 0x19e   : > { %1340 = vst [vmem:[#allocation2 + $0xf0] sm:$0xff] %v1276_v25  ;;  %1372 = vst [vmem:[#allocation2 + $0x1f0] sm:$0xff] %v1308_v26  ;;  %v1277_v35 = vadd.f32 %v2331_v33, %v604_v23  ;;  %v1309_v36 = vadd.f32 %v2363_v34, %v636_v24  ;;  %v1106_v37 = vpop.f32.mrb[31].mxu0  ;;  %v1234_v38 = vpop.f32.mrb[31].mxu1  ;;  %v1402_v13 = vld [vmem:[#allocation2 + $0xc0] sm:$0xff] (!%p1921_p13)  ;;  %v1411_v26 = vld [vmem:[#allocation2 + $0x108] sm:$0xff] (!%p1921_p13) }
 0x19f   : > { %1338 = vst [vmem:[#allocation2 + $0xe0] sm:$0xff] %v1274_v31  ;;  %1370 = vst [vmem:[#allocation2 + $0x1e0] sm:$0xff] %v1306_v32  ;;  %v1275_v39 = vadd.f32 %v1106_v37, %v602_v29  ;;  %v1307_v40 = vadd.f32 %v1234_v38, %v634_v30  ;;  %v1405_v17 = vld [vmem:[#allocation2 + $0xd8] sm:$0xff] (!%p1921_p13)  ;;  %v1410_v24 = vld [vmem:[#allocation2 + $0x100] sm:$0xff] (!%p1921_p13) }
 0x1a0   : > { %1341 = vst [vmem:[#allocation2 + $0xf8] sm:$0xff] %v1277_v35  ;;  %1373 = vst [vmem:[#allocation2 + $0x1f8] sm:$0xff] %v1309_v36  ;;  %v1403_v14 = vld [vmem:[#allocation2 + $0xc8] sm:$0xff] (!%p1921_p13)  ;;  %v2121_v20 = vpack.c.bf16 (!%p1921_p13), %v1405_v17, %v1404_v15  ;;  %v1412_v27 = vld [vmem:[#allocation2 + $0x110] sm:$0xff] (!%p1921_p13)  ;;  %v2136_v29 = vpack.c.bf16 (!%p1921_p13), %v1411_v26, %v1410_v24 }
 0x1a1   : > { %1339 = vst [vmem:[#allocation2 + $0xe8] sm:$0xff] %v1275_v39  ;;  %1371 = vst [vmem:[#allocation2 + $0x1e8] sm:$0xff] %v1307_v40  ;;  %v2116_v16 = vpack.c.bf16 (!%p1921_p13), %v1403_v14, %v1402_v13  ;;  %v2141_v30 = vpack.c.bf16 (!%p1921_p13), %v1413_v28, %v1412_v27  ;;  %v1414_v31 = vld [vmem:[#allocation2 + $0x120] sm:$0xff] (!%p1921_p13)  ;;  %v1415_v32 = vld [vmem:[#allocation2 + $0x128] sm:$0xff] (!%p1921_p13) }
 0x1a2   : > { %2225 = vst [vmem:[%s2754_s25 + $0x68] sm:$0xff] %v2121_v20   ;;  %v1416_v33 = vld [vmem:[#allocation2 + $0x130] sm:$0xff]  ;;  %v2146_v34 = vpack.c.bf16 %v1415_v32, %v1414_v31  ;;  %v1417_v35 = vld [vmem:[#allocation2 + $0x138] sm:$0xff]  ;;  %v1418_v36 = vld [vmem:[#allocation2 + $0x140] sm:$0xff] }
 0x1a3   : > { %2224 = vst [vmem:[%s2754_s25 + $0x60] sm:$0xff] %v2116_v16   ;;  %v1419_v37 = vld [vmem:[#allocation2 + $0x148] sm:$0xff]  ;;  %2228 = vst [vmem:[%s2754_s25 + $0x80] sm:$0xff] %v2136_v29   ;;  %v2151_v38 = vpack.c.bf16 %v1417_v35, %v1416_v33  ;;  %v1420_v40 = vld [vmem:[#allocation2 + $0x150] sm:$0xff] }
 0x1a4   : > { %2229 = vst [vmem:[%s2754_s25 + $0x88] sm:$0xff] %v2141_v30   ;;  %v2156_v39 = vpack.c.bf16 %v1419_v37, %v1418_v36  ;;  %2230 = vst [vmem:[%s2754_s25 + $0x90] sm:$0xff] %v2146_v34   ;;  %v2161_v43 = vpack.c.bf16 %v1421_v41, %v1420_v40  ;;  %v1430_v54 = vld [vmem:[#allocation2 + $0x1a0] sm:$0xff]  ;;  %v1431_v55 = vld [vmem:[#allocation2 + $0x1a8] sm:$0xff] }
 0x1a5   : > { %v1408_v22 = vld [vmem:[#allocation2 + $0xf0] sm:$0xff]  ;;  %2231 = vst [vmem:[%s2754_s25 + $0x98] sm:$0xff] %v2151_v38   ;;  %2234 = vst [vmem:[%s2754_s25 + $0xb0] sm:$0xff] %v2166_v47   ;;  %v2186_v57 = vpack.c.bf16 %v1431_v55, %v1430_v54  ;;  %v1433_v59 = vld [vmem:[#allocation2 + $0x1b8] sm:$0xff] }
 0x1a6   : > { %v1406_v18 = vld [vmem:[#allocation2 + $0xe0] sm:$0xff]  ;;  %2232 = vst [vmem:[%s2754_s25 + $0xa0] sm:$0xff] %v2156_v39   ;;  %2233 = vst [vmem:[%s2754_s25 + $0xa8] sm:$0xff] %v2161_v43   ;;  %v1432_v58 = vld [vmem:[#allocation2 + $0x1b0] sm:$0xff] }
 0x1a7   : > { %v1409_v23 = vld [vmem:[#allocation2 + $0xf8] sm:$0xff]  ;;  %2235 = vst [vmem:[%s2754_s25 + $0xb8] sm:$0xff] %v2171_v48   ;;  %v1434_v60 = vld [vmem:[#allocation2 + $0x1c0] sm:$0xff]  ;;  %2236 = vst [vmem:[%s2754_s25 + $0xc0] sm:$0xff] %v2176_v52   ;;  %v2191_v61 = vpack.c.bf16 %v1433_v59, %v1432_v58 }
 0x1a8   : > { %v1407_v19 = vld [vmem:[#allocation2 + $0xe8] sm:$0xff]  ;;  %v2131_v25 = vpack.c.bf16 %v1409_v23, %v1408_v22  ;;  %v1436_v63 = vld [vmem:[#allocation2 + $0x1d0] sm:$0xff]  ;;  %v1437_v0 = vld [vmem:[#allocation2 + $0x1d8] sm:$0xff]  ;;  %2237 = vst [vmem:[%s2754_s25 + $0xc8] sm:$0xff] %v2181_v56  }
 0x1a9   : > { %v2126_v21 = vpack.c.bf16 %v1407_v19, %v1406_v18  ;;  %v1435_v62 = vld [vmem:[#allocation2 + $0x1c8] sm:$0xff]  ;;  %2238 = vst [vmem:[%s2754_s25 + $0xd0] sm:$0xff] %v2186_v57   ;;  %v2201_v2 = vpack.c.bf16 %v1437_v0, %v1436_v63  ;;  %v1438_v3 = vld [vmem:[#allocation2 + $0x1e0] sm:$0xff]  ;;  %v1440_v5 = vld [vmem:[#allocation2 + $0x1f0] sm:$0xff] }
 0x1aa   : > { %2227 = vst [vmem:[%s2754_s25 + $0x78] sm:$0xff] %v2131_v25   ;;  %v2196_v1 = vpack.c.bf16 %v1435_v62, %v1434_v60  ;;  %v1439_v4 = vld [vmem:[#allocation2 + $0x1e8] sm:$0xff]  ;;  %2239 = vst [vmem:[%s2754_s25 + $0xd8] sm:$0xff] %v2191_v61   ;;  %v1441_v7 = vld [vmem:[#allocation2 + $0x1f8] sm:$0xff] }
 0x1ab   : > { %2226 = vst [vmem:[%s2754_s25 + $0x70] sm:$0xff] %v2126_v21   ;;  %v2206_v6 = vpack.c.bf16 %v1439_v4, %v1438_v3  ;;  %2241 = vst [vmem:[%s2754_s25 + $0xe8] sm:$0xff] %v2201_v2   ;;  %v2211_v8 = vpack.c.bf16 %v1441_v7, %v1440_v5 }
 0x1ac   : > { %2240 = vst [vmem:[%s2754_s25 + $0xe0] sm:$0xff] %v2196_v1  }
 0x1ad   : > { %2242 = vst [vmem:[%s2754_s25 + $0xf0] sm:$0xff] %v2206_v6   ;;  %2243 = vst [vmem:[%s2754_s25 + $0xf8] sm:$0xff] %v2211_v8  }
 0x1ae PF: > { %s12_s15 = sadd.s32 1, %s2531_s15   ;;  %s2920_s9 = smov %s2511_s10 }
 0x1af   : > { %p9_p0 = scmp.ge.s32.totalorder %s12_s15, 100   ;;  %s2921_s10 = smov %s2600_s22 }
 0x1b0   : > { %s2922_s11 = smov %s2523_s13  ;;  %s2923_s12 = smov %s2527_s14 }
 0x1b1   : > { %s2924_s13 = smov %s2927_s16  ;;  %s2925_s14 = smov %s2931_s17 }
 0x1b2   :  { %11 = sbr.rel (!%p9_p0) target bundleno = 4 (0x4), region = 115 }

</bundles_post_ra>
